<compile_context>
chip_gen: v7x
topology: tpu7x:2x2x1
jax: 0.10.0
libtpu: 0.0.40
codegen_flags: <defaults>
</compile_context>

<pallas_src>
import numpy as np
from functools import partial

import jax
import jax.numpy as jnp
from jax import lax
from jax.experimental import pallas as pl
from jax.experimental.pallas import tpu as pltpu


def _round_up(x, m):
    return (x + m - 1) // m * m


def _tile_and_pad(dim, prefer, align=128):
    """tile = min(prefer, round_up(dim, align)); padded = round_up(dim, tile)."""
    t = min(prefer, _round_up(dim, align))
    return t, _round_up(dim, t)


def _compute_pad(dim_size, k, s):
    # Mirrors Unit3D.compute_pad (TF-style SAME padding).
    if dim_size % s == 0:
        return max(k - s, 0)
    return max(k - dim_size % s, 0)


# --------------------------- Pallas kernels ---------------------------------

def _conv_stats_kernel(a_ref, b_ref, y_ref, stat_ref, acc_ref):
    """One (M,N) tile of the bf16 im2col matmul.

    a_ref   : (tm, tk)  bf16 im2col activations
    b_ref   : (tk, tn)  bf16 reshaped conv weights
    y_ref   : (tm, tn)  bf16 output block (written on the last K step)
    stat_ref: (2, tn)   row 0 = sum over tm rows, row 1 = sum of squares (f32)
    acc_ref : (tm, tn)  f32 VMEM accumulator, resident across the K grid axis
    """
    k = pl.program_id(2)

    @pl.when(k == 0)
    def _():
        acc_ref[...] = jnp.zeros_like(acc_ref)

    acc_ref[...] += jnp.dot(a_ref[...], b_ref[...],
                            preferred_element_type=jnp.float32)

    @pl.when(k == pl.num_programs(2) - 1)
    def _():
        acc = acc_ref[...]
        y_ref[...] = acc.astype(y_ref.dtype)
        # Padded rows of A are exactly zero and no bias is added in-kernel,
        # so padded accumulator rows are zero -> no row masking needed.
        stat_ref[0:1, :] = jnp.sum(acc, axis=0, keepdims=True)
        stat_ref[1:2, :] = jnp.sum(acc * acc, axis=0, keepdims=True)


def _make_affine_relu_kernel(apply_relu):
    def kernel(y_ref, scale_ref, shift_ref, o_ref):
        v = y_ref[...].astype(jnp.float32) * scale_ref[...] + shift_ref[...]
        if apply_relu:
            v = jnp.maximum(v, 0.0)
        o_ref[...] = v.astype(o_ref.dtype)
    return kernel


# ------------------------------ wrapper --------------------------------------

@partial(jax.jit, static_argnames=("stride", "eps", "use_batch_norm",
                                   "use_bias", "apply_relu"))
def unit3d_forward(x, weight, bias, gamma, beta, *, stride=(1, 1, 1),
                   eps=1e-3, use_batch_norm=True, use_bias=False,
                   apply_relu=True):
    """Forward pass of Unit3D. x: (N, C_in, T, H, W) float32, NCDHW."""
    n, c_in, t, h, w = x.shape
    c_out, _, kt, kh, kw = weight.shape
    st, sh, sw = stride

    out_t = -(-t // st)
    out_h = -(-h // sh)
    out_w = -(-w // sw)

    pad_t = _compute_pad(t, kt, st)
    pad_h = _compute_pad(h, kh, sh)
    pad_w = _compute_pad(w, kw, sw)
    xp = jnp.pad(x, [(0, 0), (0, 0),
                     (pad_t // 2, pad_t - pad_t // 2),
                     (pad_h // 2, pad_h - pad_h // 2),
                     (pad_w // 2, pad_w - pad_w // 2)])

    # ---- im2col (glue, plain JAX) in bf16: channels-last once, tap slices ----
    # TODO(synk): move the tap gather in-kernel (padded input left in HBM via
    # memory_space=pl.ANY + scalar-prefetched tap offsets + manual
    # make_async_copy double-buffering) so the kt*kh*kw-expanded matrix is
    # never materialized in HBM for large production layers.
    xp_cl = jnp.transpose(xp, (0, 2, 3, 4, 1)).astype(jnp.bfloat16)
    cols = []
    for it in range(kt):
        for ih in range(kh):
            for iw in range(kw):
                cols.append(xp_cl[:,
                                  it: it + (out_t - 1) * st + 1: st,
                                  ih: ih + (out_h - 1) * sh + 1: sh,
                                  iw: iw + (out_w - 1) * sw + 1: sw, :])
    patches = jnp.stack(cols, axis=4)            # (N, To, Ho, Wo, kk, C_in) bf16

    m = n * out_t * out_h * out_w
    k = c_in * kt * kh * kw
    a = patches.reshape(m, k)                                       # bf16
    # weight (C_out, C_in, kt, kh, kw) -> K order (kt, kh, kw, C_in) matching A.
    b_mat = jnp.transpose(weight, (2, 3, 4, 1, 0)).reshape(k, c_out)
    b_mat = b_mat.astype(jnp.bfloat16)

    # ---- tile selection: pad up to the tile, never shrink the tile ----
    tm, mp = _tile_and_pad(m, 512)
    if mp // tm < 2 and tm > 128:     # keep >=2 parallel M tiles (v7x has 2 TCs)
        tm = max(128, tm // 2)
        mp = _round_up(m, tm)
    tk, kp = _tile_and_pad(k, 512)
    npad = _round_up(c_out, 128)
    if npad <= 2048:                  # single N tile: A is streamed exactly once
        tn = npad
    else:
        tn, npad = _tile_and_pad(c_out, 1024)   # fallback for very wide layers

    num_m, num_n, num_k = mp // tm, npad // tn, kp // tk

    a_p = jnp.pad(a, [(0, mp - m), (0, kp - k)])
    b_p = jnp.pad(b_mat, [(0, kp - k), (0, npad - c_out)])

    # ---- pass 1: bf16 conv matmul, f32 accumulation, fused BN partial stats ----
    y, stats = pl.pallas_call(
        _conv_stats_kernel,
        out_shape=(jax.ShapeDtypeStruct((mp, npad), jnp.bfloat16),
                   jax.ShapeDtypeStruct((num_m, 2, npad), jnp.float32)),
        grid=(num_m, num_n, num_k),
        in_specs=[pl.BlockSpec((tm, tk), lambda i, j, kk: (i, kk)),
                  pl.BlockSpec((tk, tn), lambda i, j, kk: (kk, j))],
        out_specs=(pl.BlockSpec((tm, tn), lambda i, j, kk: (i, j)),
                   pl.BlockSpec((None, 2, tn), lambda i, j, kk: (i, 0, j))),
        scratch_shapes=[pltpu.VMEM((tm, tn), jnp.float32)],
        compiler_params=pltpu.CompilerParams(
            dimension_semantics=("parallel", "parallel", "arbitrary"),
            vmem_limit_bytes=64 * 1024 * 1024),
    )(a_p, b_p)

    # ---- tiny reduction + fold BN params into per-channel (scale, shift) ----
    gamma_p = jnp.pad(gamma.astype(jnp.float32), (0, npad - c_out))
    beta_p = jnp.pad(beta.astype(jnp.float32), (0, npad - c_out))
    bias_p = jnp.pad(bias.astype(jnp.float32), (0, npad - c_out))

    if use_batch_norm:
        # Conv bias cancels exactly under BN, so it is intentionally never added.
        total = stats.sum(axis=0)                           # (2, npad)
        mean = total[0] / m
        var = jnp.maximum(total[1] / m - mean * mean, 0.0)  # biased (train) var
        scale = gamma_p * lax.rsqrt(var + eps)
        shift = beta_p - mean * scale
    else:
        scale = jnp.ones((npad,), jnp.float32)
        shift = bias_p if use_bias else jnp.zeros((npad,), jnp.float32)

    # ---- pass 2: fused per-channel affine + ReLU (bf16 in, f32 out) ----
    ew_budget = 24 * 1024 * 1024                   # VMEM budget (safe on v7x)
    bytes_per_row = npad * (2 * 2 + 4 * 2)         # dbl-buffered bf16 in + f32 out
    tm_ew = tm
    while (tm_ew * 2 <= 1024 and mp % (tm_ew * 2) == 0
           and (tm_ew * 2) * bytes_per_row <= ew_budget):
        tm_ew *= 2

    out_flat = pl.pallas_call(
        _make_affine_relu_kernel(apply_relu),
        out_shape=jax.ShapeDtypeStruct((mp, npad), jnp.float32),
        grid=(mp // tm_ew,),
        in_specs=[pl.BlockSpec((tm_ew, npad), lambda i: (i, 0)),
                  pl.BlockSpec((1, npad), lambda i: (0, 0)),
                  pl.BlockSpec((1, npad), lambda i: (0, 0))],
        out_specs=pl.BlockSpec((tm_ew, npad), lambda i: (i, 0)),
        compiler_params=pltpu.CompilerParams(
            dimension_semantics=("parallel",),
            vmem_limit_bytes=64 * 1024 * 1024),
    )(y, scale.reshape(1, npad), shift.reshape(1, npad))

    # TODO(synk): a channels-last consumer could take out_flat[:m, :c_out]
    # reshaped to NDHWC directly and skip this final XLA layout pass.
    out = out_flat[:m, :c_out].reshape(n, out_t, out_h, out_w, c_out)
    return jnp.transpose(out, (0, 4, 1, 2, 3))   # back to NCDHW


# ------------------------- pure-JAX reference --------------------------------

def unit3d_reference(x, weight, bias, gamma, beta, *, stride, eps=1e-3,
                     use_batch_norm=True, use_bias=False, apply_relu=True):
    n, c_in, t, h, w = x.shape
    kt, kh, kw = weight.shape[2:]
    st, sh, sw = stride
    pad_t = _compute_pad(t, kt, st)
    pad_h = _compute_pad(h, kh, sh)
    pad_w = _compute_pad(w, kw, sw)
    y = lax.conv_general_dilated(
        x, weight, window_strides=(st, sh, sw),
        padding=[(pad_t // 2, pad_t - pad_t // 2),
                 (pad_h // 2, pad_h - pad_h // 2),
                 (pad_w // 2, pad_w - pad_w // 2)],
        dimension_numbers=('NCDHW', 'OIDHW', 'NCDHW'))
    if use_bias:
        y = y + bias[None, :, None, None, None]
    if use_batch_norm:
        mean = y.mean(axis=(0, 2, 3, 4), keepdims=True)
        var = ((y - mean) ** 2).mean(axis=(0, 2, 3, 4), keepdims=True)
        y = ((y - mean) * lax.rsqrt(var + eps) * gamma[None, :, None, None, None]
             + beta[None, :, None, None, None])
    if apply_relu:
        y = jnp.maximum(y, 0.0)
    return y


# --------------------------------- main ---------------------------------------

if __name__ == "__main__":
    # Unit3D(in_channels=4, output_channels=8, kernel_shape=(3,3,3),
    #        stride=(2,2,2), use_batch_norm=True, use_bias=False)
    in_channels, out_channels = 4, 8
    kernel_shape = (3, 3, 3)
    stride = (2, 2, 2)

    key = jax.random.PRNGKey(0)
    kx, kw_ = jax.random.split(key)
    x = jax.random.normal(kx, (2, in_channels, 8, 16, 16), jnp.float32)
    weight = 0.05 * jax.random.normal(
        kw_, (out_channels, in_channels) + kernel_shape, jnp.float32)
    bias = jnp.zeros((out_channels,), jnp.float32)      # use_bias=False
    gamma = jnp.ones((out_channels,), jnp.float32)      # BN default init
    beta = jnp.zeros((out_channels,), jnp.float32)

    out = unit3d_forward(x, weight, bias, gamma, beta,
                         stride=stride, eps=1e-3,
                         use_batch_norm=True, use_bias=False)
    out = jax.block_until_ready(out)

    ref = unit3d_reference(x, weight, bias, gamma, beta,
                           stride=stride, eps=1e-3,
                           use_batch_norm=True, use_bias=False)
    ref = jax.block_until_ready(ref)

    assert out.shape == ref.shape == (2, out_channels, 4, 8, 8), out.shape
    # Tolerance loosened vs the all-f32 version: MXU operands and the Y
    # intermediate are bf16 (BN statistics are still computed in f32).
    np.testing.assert_allclose(np.asarray(out), np.asarray(ref),
                               rtol=3e-2, atol=3e-2)
    print("KERNEL_OK")
</pallas_src>

<mosaic_0001>
module attributes {stable_mosaic.version = 11 : i64} {
  func.func @_conv_stats_kernel(%arg0: i32, %arg1: i32, %arg2: i32, %arg3: memref<256x128xbf16, #tpu.memory_space<vmem>>, %arg4: memref<128x128xbf16, #tpu.memory_space<vmem>>, %arg5: memref<256x128xbf16, #tpu.memory_space<vmem>>, %arg6: memref<1x2x128xf32, #tpu.memory_space<vmem>>, %arg7: memref<256x128xf32, #tpu.memory_space<vmem>>) attributes {dimension_semantics = [#tpu.dimension_semantics<parallel>, #tpu.dimension_semantics<parallel>, #tpu.dimension_semantics<arbitrary>], iteration_bounds = array<i64: 2, 1, 1>, scalar_prefetch = 0 : i64, scratch_operands = 1 : i64, tpu.core_type = #tpu.core_type<tc>, window_params = [{transform_indices = @transform_0, window_bounds = array<i64: 256, 128>}, {transform_indices = @transform_1, window_bounds = array<i64: 128, 128>}, {transform_indices = @transform_2, window_bounds = array<i64: 256, 128>}, {transform_indices = @transform_3, window_bounds = array<i64: 1, 2, 128>}]} {
    %c0_i32 = arith.constant 0 : i32
    %0 = arith.cmpi eq, %arg2, %c0_i32 : i32
    %1 = arith.extui %0 : i1 to i32
    %c0_i32_0 = arith.constant 0 : i32
    %2 = arith.cmpi ne, %1, %c0_i32_0 : i32
    scf.if %2 {
      %cst_10 = arith.constant 0.000000e+00 : f32
      %12 = vector.broadcast %cst_10 : f32 to vector<256x128xf32>
      %c0_11 = arith.constant 0 : index
      %c0_12 = arith.constant 0 : index
      %13 = vector.load %arg7[%c0_11, %c0_12] : memref<256x128xf32, #tpu.memory_space<vmem>>, vector<256x128xf32>
      tpu.vector_store %arg7[%c0_11, %c0_12], %12 {strides = array<i32>} : memref<256x128xf32, #tpu.memory_space<vmem>>, vector<256x128xf32>,
    } else {
    }
    %c0 = arith.constant 0 : index
    %c0_1 = arith.constant 0 : index
    %3 = vector.load %arg7[%c0, %c0_1] : memref<256x128xf32, #tpu.memory_space<vmem>>, vector<256x128xf32>
    %c0_2 = arith.constant 0 : index
    %c0_3 = arith.constant 0 : index
    %4 = vector.load %arg3[%c0_2, %c0_3] : memref<256x128xbf16, #tpu.memory_space<vmem>>, vector<256x128xbf16>
    %c0_4 = arith.constant 0 : index
    %c0_5 = arith.constant 0 : index
    %5 = vector.load %arg4[%c0_4, %c0_5] : memref<128x128xbf16, #tpu.memory_space<vmem>>, vector<128x128xbf16>
    %cst = arith.constant dense<0.000000e+00> : vector<256x128xf32>
    %6 = tpu.matmul %4, %5, %cst {dimension_numbers = #tpu.dot_dimension_numbers<[1], [0], [0], [1], [0, 0, 1, 1], [], []>} : vector<256x128xbf16>, vector<128x128xbf16>, vector<256x128xf32> -> vector<256x128xf32>
    %7 = arith.addf %3, %6 : vector<256x128xf32>
    %c0_6 = arith.constant 0 : index
    %c0_7 = arith.constant 0 : index
    %8 = vector.load %arg7[%c0_6, %c0_7] : memref<256x128xf32, #tpu.memory_space<vmem>>, vector<256x128xf32>
    tpu.vector_store %arg7[%c0_6, %c0_7], %7 {strides = array<i32>} : memref<256x128xf32, #tpu.memory_space<vmem>>, vector<256x128xf32>,
    %c0_i32_8 = arith.constant 0 : i32
    %9 = arith.cmpi eq, %arg2, %c0_i32_8 : i32
    %10 = arith.extui %9 : i1 to i32
    %c0_i32_9 = arith.constant 0 : i32
    %11 = arith.cmpi ne, %10, %c0_i32_9 : i32
    scf.if %11 {
      %c0_10 = arith.constant 0 : index
      %c0_11 = arith.constant 0 : index
      %12 = vector.load %arg7[%c0_10, %c0_11] : memref<256x128xf32, #tpu.memory_space<vmem>>, vector<256x128xf32>
      %13 = arith.truncf %12 : vector<256x128xf32> to vector<256x128xbf16>
      %c0_12 = arith.constant 0 : index
      %c0_13 = arith.constant 0 : index
      %14 = vector.load %arg5[%c0_12, %c0_13] : memref<256x128xbf16, #tpu.memory_space<vmem>>, vector<256x128xbf16>
      tpu.vector_store %arg5[%c0_12, %c0_13], %13 {strides = array<i32>} : memref<256x128xbf16, #tpu.memory_space<vmem>>, vector<256x128xbf16>,
      %cst_14 = arith.constant dense<0.000000e+00> : vector<128xf32>
      %15 = vector.multi_reduction <add>, %12, %cst_14 [0] : vector<256x128xf32> to vector<128xf32>
      %16 = vector.shape_cast %15 : vector<128xf32> to vector<1x128xf32>
      %c0_15 = arith.constant 0 : index
      %c0_16 = arith.constant 0 : index
      %c0_17 = arith.constant 0 : index
      %17 = vector.load %arg6[%c0_15, %c0_16, %c0_17] : memref<1x2x128xf32, #tpu.memory_space<vmem>>, vector<1x1x128xf32>
      %18 = vector.shape_cast %17 : vector<1x1x128xf32> to vector<1x128xf32>
      %19 = vector.shape_cast %16 : vector<1x128xf32> to vector<1x1x128xf32>
      tpu.vector_store %arg6[%c0_15, %c0_16, %c0_17], %19 {strides = array<i32>} : memref<1x2x128xf32, #tpu.memory_space<vmem>>, vector<1x1x128xf32>,
      %20 = arith.mulf %12, %12 : vector<256x128xf32>
      %cst_18 = arith.constant dense<0.000000e+00> : vector<128xf32>
      %21 = vector.multi_reduction <add>, %20, %cst_18 [0] : vector<256x128xf32> to vector<128xf32>
      %22 = vector.shape_cast %21 : vector<128xf32> to vector<1x128xf32>
      %c0_19 = arith.constant 0 : index
      %c1 = arith.constant 1 : index
      %c0_20 = arith.constant 0 : index
      %23 = vector.load %arg6[%c0_19, %c1, %c0_20] : memref<1x2x128xf32, #tpu.memory_space<vmem>>, vector<1x1x128xf32>
      %24 = vector.shape_cast %23 : vector<1x1x128xf32> to vector<1x128xf32>
      %25 = vector.shape_cast %22 : vector<1x128xf32> to vector<1x1x128xf32>
      tpu.vector_store %arg6[%c0_19, %c1, %c0_20], %25 {strides = array<i32>} : memref<1x2x128xf32, #tpu.memory_space<vmem>>, vector<1x1x128xf32>,
    } else {
    }
    return
  }
  func.func @transform_0(%arg0: i32, %arg1: i32, %arg2: i32) -> (i32, i32) {
    %c0_i32 = arith.constant 0 : i32
    return %arg0, %arg2 : i32, i32
  }
  func.func @transform_1(%arg0: i32, %arg1: i32, %arg2: i32) -> (i32, i32) {
    %c0_i32 = arith.constant 0 : i32
    return %arg2, %arg1 : i32, i32
  }
  func.func @transform_2(%arg0: i32, %arg1: i32, %arg2: i32) -> (i32, i32) {
    %c0_i32 = arith.constant 0 : i32
    return %arg0, %arg1 : i32, i32
  }
  func.func @transform_3(%arg0: i32, %arg1: i32, %arg2: i32) -> (i32, i32, i32) {
    %c0_i32 = arith.constant 0 : i32
    %c0_i32_0 = arith.constant 0 : i32
    return %arg0, %c0_i32, %arg1 : i32, i32, i32
  }
}

module attributes {stable_mosaic.version = 11 : i64} {
  func.func @kernel(%arg0: i32, %arg1: memref<512x128xbf16, #tpu.memory_space<vmem>>, %arg2: memref<1x128xf32, #tpu.memory_space<vmem>>, %arg3: memref<1x128xf32, #tpu.memory_space<vmem>>, %arg4: memref<512x128xf32, #tpu.memory_space<vmem>>) attributes {dimension_semantics = [#tpu.dimension_semantics<parallel>], iteration_bounds = array<i64: 1>, scalar_prefetch = 0 : i64, scratch_operands = 0 : i64, tpu.core_type = #tpu.core_type<tc>, window_params = [{transform_indices = @transform_0, window_bounds = array<i64: 512, 128>}, {pipeline_mode = #tpu.pipeline_mode<synchronous>, transform_indices = @transform_1, window_bounds = array<i64: 1, 128>}, {pipeline_mode = #tpu.pipeline_mode<synchronous>, transform_indices = @transform_2, window_bounds = array<i64: 1, 128>}, {transform_indices = @transform_3, window_bounds = array<i64: 512, 128>}]} {
    %c0 = arith.constant 0 : index
    %c0_0 = arith.constant 0 : index
    %0 = vector.load %arg1[%c0, %c0_0] : memref<512x128xbf16, #tpu.memory_space<vmem>>, vector<512x128xbf16>
    %1 = arith.extf %0 : vector<512x128xbf16> to vector<512x128xf32>
    %c0_1 = arith.constant 0 : index
    %c0_2 = arith.constant 0 : index
    %2 = vector.load %arg2[%c0_1, %c0_2] : memref<1x128xf32, #tpu.memory_space<vmem>>, vector<1x128xf32>
    %3 = vector.broadcast %2 : vector<1x128xf32> to vector<512x128xf32>
    %4 = arith.mulf %1, %3 : vector<512x128xf32>
    %c0_3 = arith.constant 0 : index
    %c0_4 = arith.constant 0 : index
    %5 = vector.load %arg3[%c0_3, %c0_4] : memref<1x128xf32, #tpu.memory_space<vmem>>, vector<1x128xf32>
    %6 = vector.broadcast %5 : vector<1x128xf32> to vector<512x128xf32>
    %7 = arith.addf %4, %6 : vector<512x128xf32>
    %cst = arith.constant 0.000000e+00 : f32
    %8 = vector.broadcast %cst : f32 to vector<512x128xf32>
    %9 = arith.maximumf %7, %8 : vector<512x128xf32>
    %c0_5 = arith.constant 0 : index
    %c0_6 = arith.constant 0 : index
    %10 = vector.load %arg4[%c0_5, %c0_6] : memref<512x128xf32, #tpu.memory_space<vmem>>, vector<512x128xf32>
    tpu.vector_store %arg4[%c0_5, %c0_6], %9 {strides = array<i32>} : memref<512x128xf32, #tpu.memory_space<vmem>>, vector<512x128xf32>,
    return
  }
  func.func @transform_0(%arg0: i32) -> (i32, i32) {
    %c0_i32 = arith.constant 0 : i32
    %c0_i32_0 = arith.constant 0 : i32
    return %arg0, %c0_i32 : i32, i32
  }
  func.func @transform_1(%arg0: i32) -> (i32, i32) {
    %c0_i32 = arith.constant 0 : i32
    %c0_i32_0 = arith.constant 0 : i32
    %c0_i32_1 = arith.constant 0 : i32
    return %c0_i32, %c0_i32_0 : i32, i32
  }
  func.func @transform_2(%arg0: i32) -> (i32, i32) {
    %c0_i32 = arith.constant 0 : i32
    %c0_i32_0 = arith.constant 0 : i32
    %c0_i32_1 = arith.constant 0 : i32
    return %c0_i32, %c0_i32_0 : i32, i32
  }
  func.func @transform_3(%arg0: i32) -> (i32, i32) {
    %c0_i32 = arith.constant 0 : i32
    %c0_i32_0 = arith.constant 0 : i32
    return %arg0, %c0_i32 : i32, i32
  }
}

</mosaic_0001>

<bundles_post_ra>
// kernel: unit3d_forward.3
= control target key start
LH: loop header
LB: loop body
LE: loop exit
PB: predicated region body
PF: predicated region fallthrough
CT: control target
= control target key end

     0   :  { %8 = vsyncpa [#allocation3], 0  ;;  %s946_s0 = inlined_call_operand.hbm [shape: bf16[512,128], index: 0, kind: input, shape index: {}]   ;;  %s947_s1 = inlined_call_operand.hbm [shape: f32[1,128], index: 1, kind: input, shape index: {}]   ;;  %s948_s2 = inlined_call_operand.hbm [shape: f32[1,128], index: 2, kind: input, shape index: {}]   ;;  %s949_s3 = inlined_call_operand.hbm [shape: f32[512,128], index: 3, kind: output, shape index: {}]  }
   0x1   :  { %9 = vsyncpa [#allocation6], 0 }
   0x2   :  { %10 = vsyncpa [#allocation4], 0  ;;  %s731_s12 = smov [#allocation5]   ;;  %s732_s14 = smov [#allocation2]  }
   0x3   :  { %s29_s13 = sshll.u32 %s731_s12, 4  ;;  %s16_s15 = sshll.u32 %s732_s14, 4  ;;  %s30_s13 = int_to_ptr.vmem [resolvable:$true] %s29_s13  ;;  %s759_s15 = int_to_ptr.vmem [resolvable:$true] %s16_s15 }
   0x4   :  { %s637_s18 = scalar_lea.hbm %s947_s1, 16 }
   0x5   :  { %p638_p0 = scmp.ne.s32.totalorder %s947_s1, %s637_s18  ;;  %p641_p1 = scmp.lt.u32.totalorder %s637_s18, %s947_s1 }
   0x7   :  { %p643_p2 = pnand %p641_p1, %p638_p0 }
   0x9   :  { %646 = shalt.err (!%p643_p2)
}
   0xa   :  { %s647_s23 = scalar_lea.vmem %s30_s13, 16  ;;  %s651_s24 = scalar_lea.vmem %s30_s13, 32 }
   0xb   :  { %p648_p3 = scmp.ne.s32.totalorder %s30_s13, %s647_s23  ;;  %p652_p4 = scmp.lt.s32.totalorder %s30_s13, %s30_s13 }
   0xc   :  { %p653_p5 = scmp.lt.s32.totalorder %s651_s24, %s647_s23 }
   0xe   :  { %p654_p6 = por %p653_p5, %p652_p4 }
  0x10   :  { %p655_p7 = pnand %p654_p6, %p648_p3 }
  0x12   :  { %658 = shalt.err (!%p655_p7)
}
  0x13   :  { %32 = dma.hbm_to_vmem [thread:$0]  %s947_s1, 16, %s30_s13, [#allocation6]  }
  0x14   :  { %s659_s29 = scalar_lea.hbm %s946_s0, 4096 }
  0x15   :  { %p660_p8 = scmp.ne.s32.totalorder %s946_s0, %s659_s29  ;;  %p663_p9 = scmp.lt.u32.totalorder %s659_s29, %s946_s0 }
  0x17   :  { %p665_p10 = pnand %p663_p9, %p660_p8 }
  0x19   :  { %668 = shalt.err (!%p665_p10)
}
  0x1a   :  { %s669_s7 = scalar_lea.vmem %s759_s15, 4096  ;;  %p674_p12 = scmp.lt.s32.totalorder %s759_s15, %s759_s15 }
  0x1b   :  { %p670_p11 = scmp.ne.s32.totalorder %s759_s15, %s669_s7  ;;  %p675_p13 = scmp.lt.s32.totalorder %s669_s7, %s669_s7 }
  0x1d   :  { %p676_p0 = por %p675_p13, %p674_p12 }
  0x1f   :  { %p677_p1 = pnand %p676_p0, %p670_p11 }
  0x21   :  { %680 = shalt.err (!%p677_p1)
}
  0x22   :  { %s733_s1 = smov 64   ;;  %s734_s8 = smov 4  }
  0x23   :  { %22 = dma.hbm_to_vmem [thread:$0]  %s946_s0, 4096, %s759_s15, [#allocation3], %s733_s1, %s733_s1, %s734_s8  }
  0x24   :  { %s735_s11 = smov [#allocation7]   ;;  %s681_s16 = scalar_lea.hbm %s948_s2, 16 }
  0x25   :  { %s39_s12 = sshll.u32 %s735_s11, 4  ;;  %p682_p2 = scmp.ne.s32.totalorder %s948_s2, %s681_s16  ;;  %s40_s12 = int_to_ptr.vmem [resolvable:$true] %s39_s12 }
  0x26   :  { %p685_p3 = scmp.lt.u32.totalorder %s681_s16, %s948_s2 }
  0x28   :  { %p687_p4 = pnand %p685_p3, %p682_p2 }
  0x2a   :  { %690 = shalt.err (!%p687_p4)
}
  0x2b   :  { %s691_s21 = scalar_lea.vmem %s40_s12, 16  ;;  %s695_s0 = scalar_lea.vmem %s40_s12, 32 }
  0x2c   :  { %p692_p5 = scmp.ne.s32.totalorder %s40_s12, %s691_s21  ;;  %p696_p6 = scmp.lt.s32.totalorder %s40_s12, %s40_s12 }
  0x2d   :  { %p697_p7 = scmp.lt.s32.totalorder %s695_s0, %s691_s21 }
  0x2f   :  { %p698_p8 = por %p697_p7, %p696_p6 }
  0x31   :  { %p699_p9 = pnand %p698_p8, %p692_p5 }
  0x33   :  { %702 = shalt.err (!%p699_p9)
}
  0x34   :  { %42 = dma.hbm_to_vmem [thread:$0]  %s948_s2, 16, %s40_s12, [#allocation6]  }
  0x35   :  { %725 = dma.done.wait [#allocation3], 4096  }
  0x36   :  { %726 = vsyncadd [#allocation3], 4294963200 }
  0x37   :  { %727 = dma.done.wait [#allocation6], 32  }
  0x38   :  { %728 = vsyncadd [#allocation6], 4294967264  ;;  %v471_v0 = vld [vmem:[#allocation2] sm:$0xff]   ;;  %v598_v4 = vld [vmem:[#allocation2 + $0x8] sm:$0xff]   ;;  %s736_s2 = smov [#allocation8]  }
  0x39   :  { %v802_v1 = vld [vmem:[#allocation5] ss:$0 sm:$0xff]  ;;  %v472_v2 = vunpack.c.l.bf16 %v471_v0  ;;  %v473_v3 = vunpack.c.h.bf16 %v471_v0  ;;  %v599_v5 = vld [vmem:[#allocation2 + $0x10] sm:$0xff]   ;;  %v600_v6 = vld [vmem:[#allocation2 + $0x18] sm:$0xff]   ;;  %v476_v8 = vunpack.c.l.bf16 %v598_v4  ;;  %v477_v9 = vunpack.c.h.bf16 %v598_v4  ;;  %s455_s23 = sshll.u32 %s736_s2, 4  ;;  %s456_s23 = int_to_ptr.vmem [resolvable:$true] %s455_s23 }
  0x3a   :  { %v804_v7 = vld [vmem:[#allocation7] ss:$0 sm:$0xff]  ;;  %v480_v10 = vunpack.c.l.bf16 %v599_v5  ;;  %v481_v11 = vunpack.c.h.bf16 %v599_v5  ;;  %v484_v14 = vunpack.c.l.bf16 %v600_v6  ;;  %v485_v15 = vunpack.c.h.bf16 %v600_v6  ;;  %v602_v33 = vld [vmem:[#allocation2 + $0x28] sm:$0xff]   ;;  %v603_v34 = vld [vmem:[#allocation2 + $0x30] sm:$0xff]   ;;  %s703_s24 = scalar_lea.vmem %s456_s23, 8192  ;;  %p708_p11 = scmp.lt.s32.totalorder %s456_s23, %s456_s23 }
  0x3b   :  { %v187_v12 = vmul.f32 %v472_v2, %v802_v1  ;;  %v188_v13 = vmul.f32 %v473_v3, %v802_v1  ;;  %v189_v16 = vmul.f32 %v476_v8, %v802_v1  ;;  %v190_v17 = vmul.f32 %v477_v9, %v802_v1  ;;  %v601_v28 = vld [vmem:[#allocation2 + $0x20] sm:$0xff]   ;;  %v604_v39 = vld [vmem:[#allocation2 + $0x38] sm:$0xff]   ;;  %v606_v6 = vld [vmem:[#allocation2 + $0x48] sm:$0xff]   ;;  %p704_p10 = scmp.ne.s32.totalorder %s456_s23, %s703_s24  ;;  %p709_p12 = scmp.lt.s32.totalorder %s703_s24, %s703_s24 }
  0x3c   :  { %v191_v18 = vmul.f32 %v480_v10, %v802_v1  ;;  %v192_v19 = vmul.f32 %v481_v11, %v802_v1  ;;  %v193_v22 = vmul.f32 %v484_v14, %v802_v1  ;;  %v194_v23 = vmul.f32 %v485_v15, %v802_v1  ;;  %v605_v0 = vld [vmem:[#allocation2 + $0x40] sm:$0xff]   ;;  %v607_v8 = vld [vmem:[#allocation2 + $0x50] sm:$0xff]  }
  0x3d   :  { %v258_v20 = vadd.f32 %v804_v7, %v187_v12  ;;  %v259_v21 = vadd.f32 %v804_v7, %v188_v13  ;;  %v260_v24 = vadd.f32 %v804_v7, %v189_v16  ;;  %v261_v25 = vadd.f32 %v804_v7, %v190_v17  ;;  %v608_v13 = vld [vmem:[#allocation2 + $0x58] sm:$0xff]   ;;  %p710_p13 = por %p709_p12, %p708_p11 }
  0x3e   :  { %v262_v26 = vadd.f32 %v804_v7, %v191_v18  ;;  %v263_v27 = vadd.f32 %v804_v7, %v192_v19  ;;  %v264_v31 = vadd.f32 %v804_v7, %v193_v22  ;;  %v265_v32 = vadd.f32 %v804_v7, %v194_v23 }
  0x3f   :  { %v322_v29 = vmax.f32 %v258_v20, 0.0  ;;  %v323_v30 = vmax.f32 %v259_v21, 0.0  ;;  %v324_v35 = vmax.f32 %v260_v24, 0.0  ;;  %v325_v36 = vmax.f32 %v261_v25, 0.0  ;;  %p711_p0 = pnand %p710_p13, %p704_p10 }
  0x40   :  { %v326_v37 = vmax.f32 %v262_v26, 0.0  ;;  %v327_v38 = vmax.f32 %v263_v27, 0.0  ;;  %v328_v40 = vmax.f32 %v264_v31, 0.0  ;;  %v329_v41 = vmax.f32 %v265_v32, 0.0 }
  0x41   :  { %386 = vst [vmem:[#allocation8] sm:$0xff] %v322_v29  ;;  %387 = vst [vmem:[#allocation8 + $0x8] sm:$0xff] %v323_v30  ;;  %v488_v42 = vunpack.c.l.bf16 %v601_v28  ;;  %v489_v43 = vunpack.c.h.bf16 %v601_v28  ;;  %v492_v44 = vunpack.c.l.bf16 %v602_v33  ;;  %v493_v45 = vunpack.c.h.bf16 %v602_v33 }
  0x42   :  { %388 = vst [vmem:[#allocation8 + $0x10] sm:$0xff] %v324_v35  ;;  %389 = vst [vmem:[#allocation8 + $0x18] sm:$0xff] %v325_v36  ;;  %v496_v46 = vunpack.c.l.bf16 %v603_v34  ;;  %v497_v47 = vunpack.c.h.bf16 %v603_v34  ;;  %v500_v50 = vunpack.c.l.bf16 %v604_v39  ;;  %v501_v51 = vunpack.c.h.bf16 %v604_v39 }
  0x43   :  { %390 = vst [vmem:[#allocation8 + $0x20] sm:$0xff] %v326_v37  ;;  %391 = vst [vmem:[#allocation8 + $0x28] sm:$0xff] %v327_v38  ;;  %v195_v48 = vmul.f32 %v488_v42, %v802_v1  ;;  %v196_v49 = vmul.f32 %v489_v43, %v802_v1  ;;  %v197_v52 = vmul.f32 %v492_v44, %v802_v1  ;;  %v504_v16 = vunpack.c.l.bf16 %v605_v0  ;;  %v609_v38 = vld [vmem:[#allocation2 + $0x60] sm:$0xff]   ;;  %v610_v43 = vld [vmem:[#allocation2 + $0x68] sm:$0xff]  }
  0x44   :  { %392 = vst [vmem:[#allocation8 + $0x30] sm:$0xff] %v328_v40  ;;  %393 = vst [vmem:[#allocation8 + $0x38] sm:$0xff] %v329_v41  ;;  %v198_v53 = vmul.f32 %v493_v45, %v802_v1  ;;  %v199_v54 = vmul.f32 %v496_v46, %v802_v1  ;;  %v200_v55 = vmul.f32 %v497_v47, %v802_v1  ;;  %v505_v17 = vunpack.c.h.bf16 %v605_v0  ;;  %v611_v44 = vld [vmem:[#allocation2 + $0x70] sm:$0xff]  }
  0x45   :  { %v266_v56 = vadd.f32 %v804_v7, %v195_v48  ;;  %v267_v57 = vadd.f32 %v804_v7, %v196_v49  ;;  %v201_v58 = vmul.f32 %v500_v50, %v802_v1  ;;  %v202_v59 = vmul.f32 %v501_v51, %v802_v1  ;;  %v612_v49 = vld [vmem:[#allocation2 + $0x78] sm:$0xff]  }
  0x46   :  { %v268_v60 = vadd.f32 %v804_v7, %v197_v52  ;;  %v269_v61 = vadd.f32 %v804_v7, %v198_v53  ;;  %v270_v62 = vadd.f32 %v804_v7, %v199_v54  ;;  %v271_v63 = vadd.f32 %v804_v7, %v200_v55 }
  0x47   :  { %v330_v2 = vmax.f32 %v266_v56, 0.0  ;;  %v331_v3 = vmax.f32 %v267_v57, 0.0  ;;  %v272_v4 = vadd.f32 %v804_v7, %v201_v58  ;;  %v273_v5 = vadd.f32 %v804_v7, %v202_v59 }
  0x48   :  { %v332_v9 = vmax.f32 %v268_v60, 0.0  ;;  %v333_v10 = vmax.f32 %v269_v61, 0.0  ;;  %v334_v11 = vmax.f32 %v270_v62, 0.0  ;;  %v335_v12 = vmax.f32 %v271_v63, 0.0 }
  0x49   :  { %394 = vst [vmem:[#allocation8 + $0x40] sm:$0xff] %v330_v2  ;;  %395 = vst [vmem:[#allocation8 + $0x48] sm:$0xff] %v331_v3  ;;  %v336_v14 = vmax.f32 %v272_v4, 0.0  ;;  %v337_v15 = vmax.f32 %v273_v5, 0.0  ;;  %v508_v18 = vunpack.c.l.bf16 %v606_v6  ;;  %v509_v19 = vunpack.c.h.bf16 %v606_v6 }
  0x4a   :  { %396 = vst [vmem:[#allocation8 + $0x50] sm:$0xff] %v332_v9  ;;  %397 = vst [vmem:[#allocation8 + $0x58] sm:$0xff] %v333_v10  ;;  %v512_v20 = vunpack.c.l.bf16 %v607_v8  ;;  %v513_v21 = vunpack.c.h.bf16 %v607_v8  ;;  %v203_v22 = vmul.f32 %v504_v16, %v802_v1  ;;  %v204_v23 = vmul.f32 %v505_v17, %v802_v1  ;;  %v614_v17 = vld [vmem:[#allocation2 + $0x88] sm:$0xff]  }
  0x4b   :  { %398 = vst [vmem:[#allocation8 + $0x60] sm:$0xff] %v334_v11  ;;  %399 = vst [vmem:[#allocation8 + $0x68] sm:$0xff] %v335_v12  ;;  %v516_v24 = vunpack.c.l.bf16 %v608_v13  ;;  %v517_v25 = vunpack.c.h.bf16 %v608_v13  ;;  %v205_v26 = vmul.f32 %v508_v18, %v802_v1  ;;  %v206_v27 = vmul.f32 %v509_v19, %v802_v1  ;;  %v613_v12 = vld [vmem:[#allocation2 + $0x80] sm:$0xff]   ;;  %v615_v18 = vld [vmem:[#allocation2 + $0x90] sm:$0xff]  }
  0x4c   :  { %400 = vst [vmem:[#allocation8 + $0x70] sm:$0xff] %v336_v14  ;;  %401 = vst [vmem:[#allocation8 + $0x78] sm:$0xff] %v337_v15  ;;  %v207_v28 = vmul.f32 %v512_v20, %v802_v1  ;;  %v208_v29 = vmul.f32 %v513_v21, %v802_v1  ;;  %v274_v30 = vadd.f32 %v804_v7, %v203_v22  ;;  %v520_v52 = vunpack.c.l.bf16 %v609_v38 }
  0x4d   :  { %v275_v31 = vadd.f32 %v804_v7, %v204_v23  ;;  %v209_v32 = vmul.f32 %v516_v24, %v802_v1  ;;  %v210_v33 = vmul.f32 %v517_v25, %v802_v1  ;;  %v276_v34 = vadd.f32 %v804_v7, %v205_v26  ;;  %v616_v23 = vld [vmem:[#allocation2 + $0x98] sm:$0xff]  }
  0x4e   :  { %v277_v35 = vadd.f32 %v804_v7, %v206_v27  ;;  %v278_v36 = vadd.f32 %v804_v7, %v207_v28  ;;  %v279_v37 = vadd.f32 %v804_v7, %v208_v29  ;;  %v338_v39 = vmax.f32 %v274_v30, 0.0 }
  0x4f   :  { %v339_v40 = vmax.f32 %v275_v31, 0.0  ;;  %v280_v41 = vadd.f32 %v804_v7, %v209_v32  ;;  %v281_v42 = vadd.f32 %v804_v7, %v210_v33  ;;  %v340_v45 = vmax.f32 %v276_v34, 0.0 }
  0x50   :  { %v341_v46 = vmax.f32 %v277_v35, 0.0  ;;  %v342_v47 = vmax.f32 %v278_v36, 0.0  ;;  %v343_v48 = vmax.f32 %v279_v37, 0.0  ;;  %402 = vst [vmem:[#allocation8 + $0x80] sm:$0xff] %v338_v39  ;;  %v521_v53 = vunpack.c.h.bf16 %v609_v38 }
  0x51   :  { %403 = vst [vmem:[#allocation8 + $0x88] sm:$0xff] %v339_v40  ;;  %v344_v50 = vmax.f32 %v280_v41, 0.0  ;;  %v345_v51 = vmax.f32 %v281_v42, 0.0  ;;  %404 = vst [vmem:[#allocation8 + $0x90] sm:$0xff] %v340_v45  ;;  %v524_v54 = vunpack.c.l.bf16 %v610_v43  ;;  %v525_v55 = vunpack.c.h.bf16 %v610_v43 }
  0x52   :  { %405 = vst [vmem:[#allocation8 + $0x98] sm:$0xff] %v341_v46  ;;  %406 = vst [vmem:[#allocation8 + $0xa0] sm:$0xff] %v342_v47  ;;  %v528_v56 = vunpack.c.l.bf16 %v611_v44  ;;  %v529_v57 = vunpack.c.h.bf16 %v611_v44  ;;  %v211_v58 = vmul.f32 %v520_v52, %v802_v1  ;;  %v212_v59 = vmul.f32 %v521_v53, %v802_v1  ;;  %v618_v53 = vld [vmem:[#allocation2 + $0xa8] sm:$0xff]  }
  0x53   :  { %407 = vst [vmem:[#allocation8 + $0xa8] sm:$0xff] %v343_v48  ;;  %408 = vst [vmem:[#allocation8 + $0xb0] sm:$0xff] %v344_v50  ;;  %v532_v60 = vunpack.c.l.bf16 %v612_v49  ;;  %v533_v61 = vunpack.c.h.bf16 %v612_v49  ;;  %v213_v62 = vmul.f32 %v524_v54, %v802_v1  ;;  %v214_v63 = vmul.f32 %v525_v55, %v802_v1  ;;  %v617_v48 = vld [vmem:[#allocation2 + $0xa0] sm:$0xff]   ;;  %v619_v54 = vld [vmem:[#allocation2 + $0xb0] sm:$0xff]  }
  0x54   :  { %409 = vst [vmem:[#allocation8 + $0xb8] sm:$0xff] %v345_v51  ;;  %v215_v0 = vmul.f32 %v528_v56, %v802_v1  ;;  %v216_v2 = vmul.f32 %v529_v57, %v802_v1  ;;  %v282_v3 = vadd.f32 %v804_v7, %v211_v58  ;;  %v283_v4 = vadd.f32 %v804_v7, %v212_v59  ;;  %v620_v59 = vld [vmem:[#allocation2 + $0xb8] sm:$0xff]  }
  0x55   :  { %v217_v5 = vmul.f32 %v532_v60, %v802_v1  ;;  %v218_v6 = vmul.f32 %v533_v61, %v802_v1  ;;  %v284_v8 = vadd.f32 %v804_v7, %v213_v62  ;;  %v285_v9 = vadd.f32 %v804_v7, %v214_v63 }
  0x56   :  { %v286_v10 = vadd.f32 %v804_v7, %v215_v0  ;;  %v287_v11 = vadd.f32 %v804_v7, %v216_v2  ;;  %v346_v13 = vmax.f32 %v282_v3, 0.0  ;;  %v347_v14 = vmax.f32 %v283_v4, 0.0 }
  0x57   :  { %v288_v15 = vadd.f32 %v804_v7, %v217_v5  ;;  %v289_v16 = vadd.f32 %v804_v7, %v218_v6  ;;  %v348_v19 = vmax.f32 %v284_v8, 0.0  ;;  %v349_v20 = vmax.f32 %v285_v9, 0.0 }
  0x58   :  { %v350_v21 = vmax.f32 %v286_v10, 0.0  ;;  %v351_v22 = vmax.f32 %v287_v11, 0.0  ;;  %410 = vst [vmem:[#allocation8 + $0xc0] sm:$0xff] %v346_v13  ;;  %411 = vst [vmem:[#allocation8 + $0xc8] sm:$0xff] %v347_v14  ;;  %v536_v26 = vunpack.c.l.bf16 %v613_v12  ;;  %v537_v27 = vunpack.c.h.bf16 %v613_v12 }
  0x59   :  { %v352_v24 = vmax.f32 %v288_v15, 0.0  ;;  %v353_v25 = vmax.f32 %v289_v16, 0.0  ;;  %412 = vst [vmem:[#allocation8 + $0xd0] sm:$0xff] %v348_v19  ;;  %413 = vst [vmem:[#allocation8 + $0xd8] sm:$0xff] %v349_v20  ;;  %v540_v28 = vunpack.c.l.bf16 %v614_v17  ;;  %v541_v29 = vunpack.c.h.bf16 %v614_v17 }
  0x5a   :  { %414 = vst [vmem:[#allocation8 + $0xe0] sm:$0xff] %v350_v21  ;;  %415 = vst [vmem:[#allocation8 + $0xe8] sm:$0xff] %v351_v22  ;;  %v544_v30 = vunpack.c.l.bf16 %v615_v18  ;;  %v545_v31 = vunpack.c.h.bf16 %v615_v18  ;;  %v219_v32 = vmul.f32 %v536_v26, %v802_v1  ;;  %v220_v33 = vmul.f32 %v537_v27, %v802_v1  ;;  %v621_v22 = vld [vmem:[#allocation2 + $0xc0] sm:$0xff]   ;;  %v622_v27 = vld [vmem:[#allocation2 + $0xc8] sm:$0xff]  }
  0x5b   :  { %416 = vst [vmem:[#allocation8 + $0xf0] sm:$0xff] %v352_v24  ;;  %417 = vst [vmem:[#allocation8 + $0xf8] sm:$0xff] %v353_v25  ;;  %v548_v34 = vunpack.c.l.bf16 %v616_v23  ;;  %v549_v35 = vunpack.c.h.bf16 %v616_v23  ;;  %v221_v36 = vmul.f32 %v540_v28, %v802_v1  ;;  %v222_v37 = vmul.f32 %v541_v29, %v802_v1  ;;  %v623_v28 = vld [vmem:[#allocation2 + $0xd0] sm:$0xff]  }
  0x5c   :  { %v223_v38 = vmul.f32 %v544_v30, %v802_v1  ;;  %v224_v39 = vmul.f32 %v545_v31, %v802_v1  ;;  %v290_v40 = vadd.f32 %v804_v7, %v219_v32  ;;  %v291_v41 = vadd.f32 %v804_v7, %v220_v33  ;;  %v624_v33 = vld [vmem:[#allocation2 + $0xd8] sm:$0xff]  }
  0x5d   :  { %v225_v42 = vmul.f32 %v548_v34, %v802_v1  ;;  %v226_v43 = vmul.f32 %v549_v35, %v802_v1  ;;  %v292_v44 = vadd.f32 %v804_v7, %v221_v36  ;;  %v293_v45 = vadd.f32 %v804_v7, %v222_v37 }
  0x5e   :  { %v294_v46 = vadd.f32 %v804_v7, %v223_v38  ;;  %v295_v47 = vadd.f32 %v804_v7, %v224_v39  ;;  %v354_v49 = vmax.f32 %v290_v40, 0.0  ;;  %v355_v50 = vmax.f32 %v291_v41, 0.0 }
  0x5f   :  { %v296_v51 = vadd.f32 %v804_v7, %v225_v42  ;;  %v297_v52 = vadd.f32 %v804_v7, %v226_v43  ;;  %v356_v55 = vmax.f32 %v292_v44, 0.0  ;;  %v357_v56 = vmax.f32 %v293_v45, 0.0 }
  0x60   :  { %v358_v57 = vmax.f32 %v294_v46, 0.0  ;;  %v359_v58 = vmax.f32 %v295_v47, 0.0  ;;  %418 = vst [vmem:[#allocation8 + $0x100] sm:$0xff] %v354_v49  ;;  %419 = vst [vmem:[#allocation8 + $0x108] sm:$0xff] %v355_v50  ;;  %v552_v62 = vunpack.c.l.bf16 %v617_v48  ;;  %v553_v63 = vunpack.c.h.bf16 %v617_v48 }
  0x61   :  { %v360_v60 = vmax.f32 %v296_v51, 0.0  ;;  %v361_v61 = vmax.f32 %v297_v52, 0.0  ;;  %420 = vst [vmem:[#allocation8 + $0x110] sm:$0xff] %v356_v55  ;;  %421 = vst [vmem:[#allocation8 + $0x118] sm:$0xff] %v357_v56  ;;  %v556_v0 = vunpack.c.l.bf16 %v618_v53  ;;  %v557_v2 = vunpack.c.h.bf16 %v618_v53 }
  0x62   :  { %422 = vst [vmem:[#allocation8 + $0x120] sm:$0xff] %v358_v57  ;;  %423 = vst [vmem:[#allocation8 + $0x128] sm:$0xff] %v359_v58  ;;  %v560_v3 = vunpack.c.l.bf16 %v619_v54  ;;  %v561_v4 = vunpack.c.h.bf16 %v619_v54  ;;  %v227_v5 = vmul.f32 %v552_v62, %v802_v1  ;;  %v228_v6 = vmul.f32 %v553_v63, %v802_v1  ;;  %v625_v58 = vld [vmem:[#allocation2 + $0xe0] sm:$0xff]   ;;  %v626_v63 = vld [vmem:[#allocation2 + $0xe8] sm:$0xff]  }
  0x63   :  { %424 = vst [vmem:[#allocation8 + $0x130] sm:$0xff] %v360_v60  ;;  %425 = vst [vmem:[#allocation8 + $0x138] sm:$0xff] %v361_v61  ;;  %v564_v8 = vunpack.c.l.bf16 %v620_v59  ;;  %v565_v9 = vunpack.c.h.bf16 %v620_v59  ;;  %v229_v10 = vmul.f32 %v556_v0, %v802_v1  ;;  %v230_v11 = vmul.f32 %v557_v2, %v802_v1  ;;  %v627_v0 = vld [vmem:[#allocation2 + $0xf0] sm:$0xff]  }
  0x64   :  { %v231_v12 = vmul.f32 %v560_v3, %v802_v1  ;;  %v232_v13 = vmul.f32 %v561_v4, %v802_v1  ;;  %v298_v14 = vadd.f32 %v804_v7, %v227_v5  ;;  %v299_v15 = vadd.f32 %v804_v7, %v228_v6  ;;  %v628_v6 = vld [vmem:[#allocation2 + $0xf8] sm:$0xff]  }
  0x65   :  { %v233_v16 = vmul.f32 %v564_v8, %v802_v1  ;;  %v234_v17 = vmul.f32 %v565_v9, %v802_v1  ;;  %v300_v18 = vadd.f32 %v804_v7, %v229_v10  ;;  %v301_v19 = vadd.f32 %v804_v7, %v230_v11 }
  0x66   :  { %v302_v20 = vadd.f32 %v804_v7, %v231_v12  ;;  %v303_v21 = vadd.f32 %v804_v7, %v232_v13  ;;  %v362_v23 = vmax.f32 %v298_v14, 0.0  ;;  %v363_v24 = vmax.f32 %v299_v15, 0.0 }
  0x67   :  { %v304_v25 = vadd.f32 %v804_v7, %v233_v16  ;;  %v305_v26 = vadd.f32 %v804_v7, %v234_v17  ;;  %v364_v29 = vmax.f32 %v300_v18, 0.0  ;;  %v365_v30 = vmax.f32 %v301_v19, 0.0 }
  0x68   :  { %v366_v31 = vmax.f32 %v302_v20, 0.0  ;;  %v367_v32 = vmax.f32 %v303_v21, 0.0  ;;  %426 = vst [vmem:[#allocation8 + $0x140] sm:$0xff] %v362_v23  ;;  %427 = vst [vmem:[#allocation8 + $0x148] sm:$0xff] %v363_v24  ;;  %v568_v36 = vunpack.c.l.bf16 %v621_v22  ;;  %v569_v37 = vunpack.c.h.bf16 %v621_v22 }
  0x69   :  { %v368_v34 = vmax.f32 %v304_v25, 0.0  ;;  %v369_v35 = vmax.f32 %v305_v26, 0.0  ;;  %428 = vst [vmem:[#allocation8 + $0x150] sm:$0xff] %v364_v29  ;;  %429 = vst [vmem:[#allocation8 + $0x158] sm:$0xff] %v365_v30  ;;  %v572_v38 = vunpack.c.l.bf16 %v622_v27  ;;  %v573_v39 = vunpack.c.h.bf16 %v622_v27 }
  0x6a   :  { %430 = vst [vmem:[#allocation8 + $0x160] sm:$0xff] %v366_v31  ;;  %431 = vst [vmem:[#allocation8 + $0x168] sm:$0xff] %v367_v32  ;;  %v576_v40 = vunpack.c.l.bf16 %v623_v28  ;;  %v577_v41 = vunpack.c.h.bf16 %v623_v28  ;;  %v235_v42 = vmul.f32 %v568_v36, %v802_v1  ;;  %v236_v43 = vmul.f32 %v569_v37, %v802_v1 }
  0x6b   :  { %432 = vst [vmem:[#allocation8 + $0x170] sm:$0xff] %v368_v34  ;;  %433 = vst [vmem:[#allocation8 + $0x178] sm:$0xff] %v369_v35  ;;  %v580_v44 = vunpack.c.l.bf16 %v624_v33  ;;  %v581_v45 = vunpack.c.h.bf16 %v624_v33  ;;  %v237_v46 = vmul.f32 %v572_v38, %v802_v1  ;;  %v238_v47 = vmul.f32 %v573_v39, %v802_v1 }
  0x6c   :  { %v239_v48 = vmul.f32 %v576_v40, %v802_v1  ;;  %v240_v49 = vmul.f32 %v577_v41, %v802_v1  ;;  %v306_v50 = vadd.f32 %v804_v7, %v235_v42  ;;  %v307_v51 = vadd.f32 %v804_v7, %v236_v43 }
  0x6d   :  { %v241_v52 = vmul.f32 %v580_v44, %v802_v1  ;;  %v242_v53 = vmul.f32 %v581_v45, %v802_v1  ;;  %v308_v54 = vadd.f32 %v804_v7, %v237_v46  ;;  %v309_v55 = vadd.f32 %v804_v7, %v238_v47 }
  0x6e   :  { %v310_v56 = vadd.f32 %v804_v7, %v239_v48  ;;  %v311_v57 = vadd.f32 %v804_v7, %v240_v49  ;;  %v370_v59 = vmax.f32 %v306_v50, 0.0  ;;  %v371_v60 = vmax.f32 %v307_v51, 0.0 }
  0x6f   :  { %v312_v61 = vadd.f32 %v804_v7, %v241_v52  ;;  %v313_v62 = vadd.f32 %v804_v7, %v242_v53  ;;  %v372_v2 = vmax.f32 %v308_v54, 0.0  ;;  %v373_v3 = vmax.f32 %v309_v55, 0.0 }
  0x70   :  { %v374_v4 = vmax.f32 %v310_v56, 0.0  ;;  %v375_v5 = vmax.f32 %v311_v57, 0.0  ;;  %434 = vst [vmem:[#allocation8 + $0x180] sm:$0xff] %v370_v59  ;;  %435 = vst [vmem:[#allocation8 + $0x188] sm:$0xff] %v371_v60  ;;  %v584_v10 = vunpack.c.l.bf16 %v625_v58  ;;  %v585_v11 = vunpack.c.h.bf16 %v625_v58 }
  0x71   :  { %v376_v8 = vmax.f32 %v312_v61, 0.0  ;;  %v377_v9 = vmax.f32 %v313_v62, 0.0  ;;  %436 = vst [vmem:[#allocation8 + $0x190] sm:$0xff] %v372_v2  ;;  %437 = vst [vmem:[#allocation8 + $0x198] sm:$0xff] %v373_v3  ;;  %v588_v12 = vunpack.c.l.bf16 %v626_v63  ;;  %v589_v13 = vunpack.c.h.bf16 %v626_v63 }
  0x72   :  { %438 = vst [vmem:[#allocation8 + $0x1a0] sm:$0xff] %v374_v4  ;;  %439 = vst [vmem:[#allocation8 + $0x1a8] sm:$0xff] %v375_v5  ;;  %v592_v14 = vunpack.c.l.bf16 %v627_v0  ;;  %v593_v15 = vunpack.c.h.bf16 %v627_v0  ;;  %v243_v16 = vmul.f32 %v584_v10, %v802_v1  ;;  %v244_v17 = vmul.f32 %v585_v11, %v802_v1 }
  0x73   :  { %440 = vst [vmem:[#allocation8 + $0x1b0] sm:$0xff] %v376_v8  ;;  %441 = vst [vmem:[#allocation8 + $0x1b8] sm:$0xff] %v377_v9  ;;  %v596_v18 = vunpack.c.l.bf16 %v628_v6  ;;  %v597_v19 = vunpack.c.h.bf16 %v628_v6  ;;  %v245_v20 = vmul.f32 %v588_v12, %v802_v1  ;;  %v246_v21 = vmul.f32 %v589_v13, %v802_v1 }
  0x74   :  { %v247_v22 = vmul.f32 %v592_v14, %v802_v1  ;;  %v248_v23 = vmul.f32 %v593_v15, %v802_v1  ;;  %v314_v24 = vadd.f32 %v804_v7, %v243_v16  ;;  %v315_v25 = vadd.f32 %v804_v7, %v244_v17 }
  0x75   :  { %v249_v26 = vmul.f32 %v596_v18, %v802_v1  ;;  %v250_v27 = vmul.f32 %v597_v19, %v802_v1  ;;  %v316_v28 = vadd.f32 %v804_v7, %v245_v20  ;;  %v317_v29 = vadd.f32 %v804_v7, %v246_v21 }
  0x76   :  { %v318_v30 = vadd.f32 %v804_v7, %v247_v22  ;;  %v319_v31 = vadd.f32 %v804_v7, %v248_v23  ;;  %v378_v32 = vmax.f32 %v314_v24, 0.0  ;;  %v379_v33 = vmax.f32 %v315_v25, 0.0 }
  0x77   :  { %v320_v34 = vadd.f32 %v804_v7, %v249_v26  ;;  %v321_v35 = vadd.f32 %v804_v7, %v250_v27  ;;  %v380_v36 = vmax.f32 %v316_v28, 0.0  ;;  %v381_v37 = vmax.f32 %v317_v29, 0.0 }
  0x78   :  { %v382_v38 = vmax.f32 %v318_v30, 0.0  ;;  %v383_v1 = vmax.f32 %v319_v31, 0.0  ;;  %442 = vst [vmem:[#allocation8 + $0x1c0] sm:$0xff] %v378_v32  ;;  %443 = vst [vmem:[#allocation8 + $0x1c8] sm:$0xff] %v379_v33 }
  0x79   :  { %v384_v39 = vmax.f32 %v320_v34, 0.0  ;;  %v385_v40 = vmax.f32 %v321_v35, 0.0  ;;  %444 = vst [vmem:[#allocation8 + $0x1d0] sm:$0xff] %v380_v36  ;;  %445 = vst [vmem:[#allocation8 + $0x1d8] sm:$0xff] %v381_v37 }
  0x7a   :  { %446 = vst [vmem:[#allocation8 + $0x1e0] sm:$0xff] %v382_v38  ;;  %447 = vst [vmem:[#allocation8 + $0x1e8] sm:$0xff] %v383_v1 }
  0x7b   :  { %448 = vst [vmem:[#allocation8 + $0x1f0] sm:$0xff] %v384_v39  ;;  %449 = vst [vmem:[#allocation8 + $0x1f8] sm:$0xff] %v385_v40 }
  0x7c   :  { %714 = shalt.err (!%p711_p0)
}
  0x7d   :  { %s715_s27 = scalar_lea.hbm %s949_s3, 8192 }
  0x7e   :  { %p716_p1 = scmp.ne.s32.totalorder %s949_s3, %s715_s27  ;;  %p719_p2 = scmp.lt.u32.totalorder %s715_s27, %s949_s3 }
  0x80   :  { %p721_p3 = pnand %p719_p2, %p716_p1 }
  0x82   :  { %724 = shalt.err (!%p721_p3)
}
  0x83   :  { %s737_s5 = smov 128   ;;  %s738_s6 = smov 8  }
  0x84   :  { %461 = dma.vmem_to_hbm [thread:$0]  %s456_s23, 8192, %s949_s3, [#allocation4], %s737_s5, %s737_s5, %s738_s6  }
  0x85   :  { %729 = dma.done.wait [#allocation4], 8192  }
  0x86   :  { %730 = vsyncadd [#allocation4], 4294959104 }
  0x87   :  { %465 = vsyncpa [#allocation3], 1 }
  0x88   :  { %466 = vsyncpa [#allocation6], 1 }
  0x89   :  { %467 = vsyncpa [#allocation4], 1 }

// kernel: unit3d_forward.2
= control target key start
LH: loop header
LB: loop body
LE: loop exit
PB: predicated region body
PF: predicated region fallthrough
CT: control target
= control target key end

     0   :  { %9 = vsyncpa [#allocation4], 0  ;;  %s2211_s0 = inlined_call_operand.hbm [shape: bf16[512,128], index: 0, kind: input, shape index: {}]   ;;  %s2212_s1 = inlined_call_operand.hbm [shape: bf16[128,128], index: 1, kind: input, shape index: {}]   ;;  %s2213_s2 = inlined_call_operand.hbm [shape: bf16[512,128], index: 2, kind: output, shape index: {0}]   ;;  %s2214_s3 = inlined_call_operand.hbm [shape: f32[2,2,128], index: 3, kind: output, shape index: {1}]  }
   0x1   :  { %11 = vsyncpa [#allocation4 + $0x1], 0 }
   0x2   :  { %12 = vsyncpa [#allocation7], 0 }
   0x3   :  { %13 = vsyncpa [#allocation5], 0 }
   0x4   :  { %15 = vsyncpa [#allocation5 + $0x1], 0 }
   0x5   :  { %16 = vsyncpa [#allocation10], 0 }
   0x6   :  { %18 = vsyncpa [#allocation10 + $0x1], 0  ;;  %s1818_s12 = smov 0   ;;  %s1820_s13 = smov 0  }
   0x7   :  { %s1822_s14 = smov 0   ;;  %s1824_s15 = smov 0  }
   0x8   :  { %s1826_s16 = smov 0   ;;  %s1828_s17 = smov 0  }
   0x9 LB: > { %s1213_s18 = sadd.s32 4294967295, %s1788_s17   ;;  %s1214_s19 = sadd.s32 4294967294, %s1788_s17   ;;  %s1788_s17 = sphi %s1828_s17, %s24_s17   ;;  %s1784_s16 = sphi %s1826_s16, %s2238_s16   ;;  %s1780_s15 = sphi %s1824_s15, %s2237_s15   ;;  %s1776_s14 = sphi %s1822_s14, %s2236_s14   ;;  %s1772_s13 = sphi %s1820_s13, %s2235_s13   ;;  %s1768_s12 = sphi %s1818_s12, %s2234_s12  }
   0xa   : > { %p65_p0 = scmp.ne.s32.totalorder %s1772_s13, %s1768_s12  ;;  %p1852_p1 = scmp.eq.s32.totalorder %s1213_s18, 0 }
   0xb   : > { %p1856_p2 = scmp.eq.s32.totalorder %s1213_s18, 1  ;;  %p125_p3 = scmp.eq.s32.totalorder %s1214_s19, 1 }
   0xc   : > { %s2219_s20 = scalar_select %p1852_p1, 1, 0 }
   0xd   : > { %s2220_s21 = scalar_select %p1856_p2, 1, 0 }
   0xe   : > { %p1862_p4 = por %p1852_p1, %p65_p0  ;;  %p1215_p5 = scmp.ge.s32.totalorder %s1788_s17, 1 }
   0xf   : > { %p1867_p6 = por %p125_p3, %p65_p0  ;;  %p160_p7 = scmp.lt.s32.totalorder %s1788_s17, 3 }
  0x10   : > { %s2221_s22 = scalar_select %p1862_p4, 1, 0 }
  0x11   : > { %s2222_s23 = scalar_select %p1867_p6, 1, 0 }
  0x12   : > { %p1872_p8 = pnand %p1215_p5, %p160_p7  ;;  %s1790_s25 = smov [#allocation6]  }
  0x13   : > { %s176_s26 = sshll.u32 %s1790_s25, 4  ;;  %s43_s28 = sadd.s32 1, %s1784_s16  ;;  %s177_s26 = int_to_ptr.vmem [resolvable:$true] %s176_s26 }
  0x14   : > { %s2223_s24 = scalar_select %p1872_p8, 1, 0 }
  0x15   : > { %p1516_p9 = pneg %p1872_p8  ;;  %s1612_s4 = scalar_lea.hbm %s2212_s1, 1024 }
  0x16   : > { %p1613_p12 = scmp.ne.s32.totalorder %s2212_s1, %s1612_s4  ;;  %p1619_p5 = scmp.lt.u32.totalorder %s1612_s4, %s2212_s1 }
  0x17   : > { %p1881_p11 = pnand %p1516_p9, %p1852_p1 }
  0x19   : > { %p1614_p13 = pneg %p1881_p11 }
  0x1b   : > { %p1615_p0 = pnand %p1614_p13, %p1613_p12 }
  0x1d   : > { %p1616_p3 = pneg %p1615_p0 }
  0x1f   : > { %p1621_p7 = pnand %p1619_p5, %p1616_p3 }
  0x21   : > { %1624 = shalt.err (!%p1621_p7)
}
  0x22   : > { %s1625_s9 = scalar_lea.vmem %s177_s26, 1024  ;;  %p1633_p1 = scmp.lt.s32.totalorder %s177_s26, %s177_s26 }
  0x23   : > { %p1626_p9 = scmp.ne.s32.totalorder %s177_s26, %s1625_s9  ;;  %p1634_p4 = scmp.lt.s32.totalorder %s1625_s9, %s1625_s9 }
  0x25   : > { %p1628_p10 = pnand %p1626_p9, %p1614_p13  ;;  %p1635_p8 = por %p1634_p4, %p1633_p1 }
  0x27   : > { %p1629_p6 = pneg %p1628_p10 }
  0x29   : > { %p1636_p2 = pnand %p1635_p8, %p1629_p6 }
  0x2b   : > { %1639 = shalt.err (!%p1636_p2)
}
  0x2c   : > { %s1791_s10 = smov 64   ;;  %s1792_s11 = smov 4  }
  0x2d   : > { %1519 = dma.hbm_to_vmem [thread:$0]  (!%p1881_p11), %s2212_s1, 1024, %s177_s26, [#allocation7], %s1791_s10, %s1791_s10, %s1792_s11  }
  0x2e   : > { %p45_p1 = scmp.ge.s32.totalorder %s43_s28, 2  ;;  %s52_s25 = sadd.s32 1, %s1776_s14 }
  0x2f   : > { %p59_p2 = scmp.ne.s32.totalorder %s1776_s14, %s1772_s13  ;;  %p60_p4 = scmp.eq.s32.totalorder %s1788_s17, 0 }
  0x30   : > { %s2240_s28 = smov (%p45_p1, %s43_s28), 0  ;;  %p2226_p8 = scmp.ne.s32.totalorder %s2220_s21, 0 }
  0x31   : > { %p1911_p6 = por %p60_p4, %p59_p2  ;;  %s47_s30 = ssub.s32 %s1784_s16, %s2240_s28 }
  0x32   : > { %p1917_p10 = por %p2226_p8, %p59_p2  ;;  %p1532_p12 = scmp.lt.s32.totalorder %s1788_s17, 2 }
  0x33   : > { %p50_p11 = scmp.eq.s32.totalorder %s47_s30, 0  ;;  %s190_s26 = sand.u32 1, %s1776_s14  }
  0x34   : > { %s1218_s4 = sshll.u32 %s190_s26, 7  ;;  %s1289_s6 = sshll.u32 %s1784_s16, 11 }
  0x35   : > { %s1926_s5 = scalar_select %p50_p11, %s1776_s14, %s52_s25  }
  0x36   : > { %s1932_s9 = scalar_lea.hbm %s2211_s0, %s1289_s6  ;;  %s194_s21 = scalar_lea.vmem [#allocation3], %s1218_s4 }
  0x37   : > { %s202_s18 = sshll.u32 %s194_s21, 4  ;;  %p1938_p13 = pnand %p1532_p12, %p1911_p6  ;;  %s1934_s18 = int_to_ptr.vmem [resolvable:$true] %s202_s18 }
  0x38   : > { %s1942_s25 = scalar_lea.sflag [#allocation4], %s190_s26  ;;  %s1640_s30 = scalar_lea.hbm %s1932_s9, 2048 }
  0x39   : > { %p1641_p0 = scmp.ne.s32.totalorder %s1932_s9, %s1640_s30  ;;  %p1642_p3 = pneg %p1938_p13 }
  0x3a   : > { %s1645_s29 = scalar_lea.hbm %s2211_s0, 4096  ;;  %p1646_p9 = scmp.lt.u32.totalorder %s1932_s9, %s2211_s0 }
  0x3b   : > { %p1643_p5 = pnand %p1642_p3, %p1641_p0  ;;  %p1647_p1 = scmp.lt.u32.totalorder %s1645_s29, %s1640_s30 }
  0x3c   : > { %p1649_p4 = scmp.lt.u32.totalorder %s1640_s30, %s1932_s9 }
  0x3d   : > { %p1644_p7 = pneg %p1643_p5  ;;  %p1648_p2 = por %p1647_p1, %p1646_p9 }
  0x3f   : > { %p1650_p6 = por %p1649_p4, %p1648_p2 }
  0x41   : > { %p1651_p8 = pnand %p1650_p6, %p1644_p7 }
  0x43   : > { %1654 = shalt.err (!%p1651_p8)
}
  0x44   : > { %s1655_s26 = scalar_lea.vmem %s1934_s18, 2048  ;;  %s1793_s21 = smov [#allocation3]  }
  0x45   : > { %p1656_p12 = scmp.ne.s32.totalorder %s1934_s18, %s1655_s26  ;;  %s1660_s4 = sshll.u32 %s1793_s21, 4  ;;  %s1661_s4 = int_to_ptr.vmem [resolvable:$false] %s1660_s4 }
  0x46   : > { %s1662_s6 = scalar_lea.vmem %s1661_s4, 4096  ;;  %p1663_p5 = scmp.lt.s32.totalorder %s1934_s18, %s1661_s4 }
  0x47   : > { %p1658_p11 = pnand %p1656_p12, %p1642_p3  ;;  %p1664_p9 = scmp.lt.s32.totalorder %s1662_s6, %s1655_s26 }
  0x49   : > { %p1659_p0 = pneg %p1658_p11  ;;  %p1665_p1 = por %p1664_p9, %p1663_p5 }
  0x4b   : > { %p1666_p2 = pnand %p1665_p1, %p1659_p0 }
  0x4d   : > { %1669 = shalt.err (!%p1666_p2)
}
  0x4e   : > { %1523 = dma.hbm_to_vmem [thread:$0]  (!%p1938_p13), %s1932_s9, 2048, %s1934_s18, %s1942_s25, %s1791_s10, %s1791_s10, %s1792_s11  }
  0x4f   : > { %p2229_p3 = scmp.ne.s32.totalorder %s2223_s24, 0 }
  0x50   : > { %s1976_s30 = sand.u32 (!%p2229_p3), 1, %s1772_s13   ;;  %p2230_p7 = scmp.ne.s32.totalorder (!%p2229_p3), %s2221_s22, 0 }
  0x51   : > { %214 = sbr.rel (%p2229_p3) target bundleno = 441 (0x1b9), region = 28  ;;  %s1222_s29 = sshll.u32 (!%p2229_p3), %s1976_s30, 7 }
  0x52   : > { %s217_s7 = scalar_lea.sflag (!%p2229_p3), [#allocation4], %s1976_s30  ;;  %s1982_s19 = scalar_lea.vmem (!%p2229_p3), [#allocation3], %s1222_s29 }
  0x58   : > { %1751 = dma.done.wait (%p2230_p7), %s217_s7, 2048  }
  0x59   : > { %1753 = vsyncadd (%p2230_p7), %s217_s7, 4294965248  ;;  %p2231_p13 = scmp.ne.s32.totalorder %s2219_s20, 0 }
  0x5b   : > { %1755 = dma.done.wait (%p2231_p13), [#allocation7], 1024  }
  0x5c   : > { %1757 = vsyncadd (%p2231_p13), [#allocation7], 4294966272  ;;  %v1588_v0 = vld [vmem:[#allocation6] sm:$0xff]   ;;  %v1589_v1 = vld [vmem:[#allocation6 + $0x8] sm:$0xff]   ;;  %s2022_s20 = scalar_lea.vmem [#allocation8], %s1222_s29  ;;  %s1322_s22 = sshll.u32 %s1780_s15, 11 }
  0x5d   : > { %1442 = vmatprep.subr.bf16.mxu0 %v1588_v0  ;;  %1490 = vmatprep.subr.bf16.mxu1 %v1588_v0  ;;  %v1590_v2 = vld [vmem:[#allocation6 + $0x10] sm:$0xff]   ;;  %v1591_v3 = vld [vmem:[#allocation6 + $0x18] sm:$0xff]   ;;  %v1596_v4 = vld [vmem:[%s1982_s19] sm:$0xff]   ;;  %s1064_s24 = sshll.u32 %s2022_s20, 4  ;;  %s2075_s9 = scalar_lea.hbm %s2213_s2, %s1322_s22  ;;  %s2077_s24 = int_to_ptr.vmem [resolvable:$true] %s1064_s24 }
  0x5e   : > { %1443 = vmatpush3.bf16.msra.mxu0 %v1588_v0  ;;  %1498 = vmatpush3.bf16.msra.mxu1 %v1588_v0  ;;  %v1592_v5 = vld [vmem:[#allocation6 + $0x20] sm:$0xff]   ;;  %v1593_v6 = vld [vmem:[#allocation6 + $0x28] sm:$0xff]   ;;  %v1594_v8 = vld [vmem:[#allocation6 + $0x30] sm:$0xff]   ;;  %s1045_s18 = scalar_lea.sflag [#allocation5], %s1976_s30  ;;  %s1670_s25 = scalar_lea.vmem %s2077_s24, 2048 }
  0x5f   : > { %1444 = vmatprep.subr.bf16.mxu0 %v1589_v1  ;;  %1491 = vmatprep.subr.bf16.mxu1 %v1589_v1  ;;  %v1604_v7 = vld [vmem:[%s1982_s19 + $0x40] sm:$0xff]   ;;  %v1595_v9 = vld [vmem:[#allocation6 + $0x38] sm:$0xff]   ;;  %v1597_v10 = vld [vmem:[%s1982_s19 + $0x8] sm:$0xff]   ;;  %p1671_p4 = scmp.ne.s32.totalorder %s2077_s24, %s1670_s25  ;;  %s1794_s8 = smov [#allocation8]  }
  0x60   : > { %1458 = vmatprep.mubr.bf16.mxu0 %v1596_v4  ;;  %1474 = vmatprep.mubr.bf16.mxu1 %v1604_v7  ;;  %v1605_v11 = vld [vmem:[%s1982_s19 + $0x48] sm:$0xff]   ;;  %v1598_v12 = vld [vmem:[%s1982_s19 + $0x10] sm:$0xff]   ;;  %v1599_v14 = vld [vmem:[%s1982_s19 + $0x18] sm:$0xff]   ;;  %s1674_s26 = sshll.u32 %s1794_s8, 4  ;;  %s1675_s26 = int_to_ptr.vmem [resolvable:$false] %s1674_s26 }
  0x61   : > { %v1606_v13 = vld [vmem:[%s1982_s19 + $0x50] sm:$0xff]   ;;  %v1607_v15 = vld [vmem:[%s1982_s19 + $0x58] sm:$0xff]   ;;  %v1600_v16 = vld [vmem:[%s1982_s19 + $0x20] sm:$0xff]   ;;  %p1672_p6 = pnand %p1671_p4, %p1917_p10  ;;  %s1676_s21 = scalar_lea.vmem %s1675_s26, 4096 }
  0x62   : > { %1445 = vmatpush3.bf16.msra.mxu0 %v1589_v1  ;;  %1499 = vmatpush3.bf16.msra.mxu1 %v1589_v1  ;;  %v1608_v17 = vld [vmem:[%s1982_s19 + $0x60] sm:$0xff]   ;;  %v1601_v18 = vld [vmem:[%s1982_s19 + $0x28] sm:$0xff]   ;;  %v1602_v20 = vld [vmem:[%s1982_s19 + $0x30] sm:$0xff]   ;;  %p1677_p12 = scmp.lt.s32.totalorder %s2077_s24, %s1675_s26  ;;  %p1678_p11 = scmp.lt.s32.totalorder %s1676_s21, %s1670_s25 }
  0x63   : > { %1446 = vmatprep.subr.bf16.mxu0 %v1590_v2  ;;  %1492 = vmatprep.subr.bf16.mxu1 %v1590_v2  ;;  %v1609_v19 = vld [vmem:[%s1982_s19 + $0x68] sm:$0xff]   ;;  %v1610_v21 = vld [vmem:[%s1982_s19 + $0x70] sm:$0xff]   ;;  %v1603_v22 = vld [vmem:[%s1982_s19 + $0x38] sm:$0xff]   ;;  %p1673_p8 = pneg %p1672_p6 }
  0x64   : > { %v1611_v23 = vld [vmem:[%s1982_s19 + $0x78] sm:$0xff]   ;;  %p1679_p0 = por %p1678_p11, %p1677_p12 }
  0x66   : > { %1447 = vmatpush3.bf16.msra.mxu0 %v1590_v2  ;;  %1500 = vmatpush3.bf16.msra.mxu1 %v1590_v2  ;;  %p1680_p5 = pnand %p1679_p0, %p1673_p8 }
  0x67   : > { %1448 = vmatprep.subr.bf16.mxu0 %v1591_v3  ;;  %1493 = vmatprep.subr.bf16.mxu1 %v1591_v3 }
  0x6a   : > { %1449 = vmatpush3.bf16.msra.mxu0 %v1591_v3  ;;  %1501 = vmatpush3.bf16.msra.mxu1 %v1591_v3 }
  0x6b   : > { %1450 = vmatprep.subr.bf16.mxu0 %v1592_v5  ;;  %1494 = vmatprep.subr.bf16.mxu1 %v1592_v5 }
  0x6e   : > { %1451 = vmatpush3.bf16.msra.mxu0 %v1592_v5  ;;  %1502 = vmatpush3.bf16.msra.mxu1 %v1592_v5 }
  0x6f   : > { %1452 = vmatprep.subr.bf16.mxu0 %v1593_v6  ;;  %1495 = vmatprep.subr.bf16.mxu1 %v1593_v6 }
  0x72   : > { %1453 = vmatpush3.bf16.msra.mxu0 %v1593_v6  ;;  %1503 = vmatpush3.bf16.msra.mxu1 %v1593_v6 }
  0x73   : > { %1454 = vmatprep.subr.bf16.mxu0 %v1594_v8  ;;  %1496 = vmatprep.subr.bf16.mxu1 %v1594_v8 }
  0x76   : > { %1455 = vmatpush3.bf16.msra.mxu0 %v1594_v8  ;;  %1504 = vmatpush3.bf16.msra.mxu1 %v1594_v8 }
  0x77   : > { %1456 = vmatprep.subr.bf16.mxu0 %v1595_v9  ;;  %1497 = vmatprep.subr.bf16.mxu1 %v1595_v9 }
  0x7a   : > { %1457 = vmatpush3.bf16.msra.mxu0 %v1595_v9  ;;  %1505 = vmatpush3.bf16.msra.mxu1 %v1595_v9 }
  0x7d   : > { %1459 = vmatmul.mubr.bf16.vlgmr.msra.gmra.mrb[0].mxu0 %v1597_v10  ;;  %1475 = vmatmul.mubr.bf16.vlgmr.msra.gmra.mrb[0].mxu1 %v1605_v11 }
  0x7e   : > { %1462 = vmatprep.mubr.bf16.mxu0 %v1598_v12  ;;  %1478 = vmatprep.mubr.bf16.mxu1 %v1606_v13 }
  0x85   : > { %1463 = vmatmul.mubr.bf16.gmra.mrb[4].mxu0 %v1599_v14  ;;  %1479 = vmatmul.mubr.bf16.gmra.mrb[4].mxu1 %v1607_v15 }
  0x86   : > { %1466 = vmatprep.mubr.bf16.mxu0 %v1600_v16  ;;  %1482 = vmatprep.mubr.bf16.mxu1 %v1608_v17 }
  0x8d   : > { %1467 = vmatmul.mubr.bf16.gmra.mrb[8].mxu0 %v1601_v18  ;;  %1483 = vmatmul.mubr.bf16.gmra.mrb[8].mxu1 %v1609_v19 }
  0x8e   : > { %1470 = vmatprep.mubr.bf16.mxu0 %v1602_v20  ;;  %1486 = vmatprep.mubr.bf16.mxu1 %v1610_v21 }
  0x95   : > { %1471 = vmatmul.mubr.bf16.gmra.mrb[12].mxu0 %v1603_v22  ;;  %1487 = vmatmul.mubr.bf16.gmra.mrb[12].mxu1 %v1611_v23 }
 0x150   : > { %v1460_v24 = vpop.f32.mrb[0].mxu0  ;;  %v2008_v25 = vpop.f32.mrb[0].mxu1 }
 0x151   : > { %v550_v26 = vpop.f32.mrb[1].mxu0  ;;  %v2010_v27 = vpop.f32.mrb[1].mxu1  ;;  %v976_v39 = vmul.f32 %v1460_v24, %v1460_v24 }
 0x152   : > { %v1461_v28 = vpop.f32.mrb[2].mxu0  ;;  %v2012_v29 = vpop.f32.mrb[2].mxu1  ;;  %v974_v30 = vmul.f32 %v550_v26, %v550_v26 }
 0x153   : > { %v1331_v31 = vpack.c.bf16 %v1461_v28, %v1460_v24  ;;  %v553_v32 = vpop.f32.mrb[3].mxu0  ;;  %v1371_v33 = vpack.c.bf16 %v2012_v29, %v2008_v25  ;;  %v2016_v34 = vpop.f32.mrb[3].mxu1  ;;  %v977_v42 = vmul.f32 %v1461_v28, %v1461_v28 }
 0x154   : > { %v1326_v35 = vpack.c.bf16 %v553_v32, %v550_v26  ;;  %v936_v36 = vadd.f32 %v553_v32, %v550_v26  ;;  %v975_v37 = vmul.f32 %v553_v32, %v553_v32  ;;  %v1366_v38 = vpack.c.bf16 %v2016_v34, %v2010_v27 }
 0x155   : > { %1403 = vst [vmem:[%s2022_s20 + $0x8] sm:$0xff] %v1331_v31   ;;  %1411 = vst [vmem:[%s2022_s20 + $0x48] sm:$0xff] %v1371_v33  }
 0x156   : > { %1327 = vst [vmem:[%s2022_s20] sm:$0xff] %v1326_v35   ;;  %v937_v40 = vadd.f32 %v1460_v24, %v936_v36  ;;  %v1006_v41 = vadd.f32 %v975_v37, %v974_v30  ;;  %1410 = vst [vmem:[%s2022_s20 + $0x40] sm:$0xff] %v1366_v38  }
 0x158   : > { %v1007_v43 = vadd.f32 %v1006_v41, %v976_v39  ;;  %v1464_v44 = vpop.f32.mrb[4].mxu0  ;;  %v938_v45 = vadd.f32 %v1461_v28, %v937_v40  ;;  %v2028_v46 = vpop.f32.mrb[4].mxu1 }
 0x159   : > { %v566_v47 = vpop.f32.mrb[5].mxu0  ;;  %v2030_v48 = vpop.f32.mrb[5].mxu1  ;;  %v980_v63 = vmul.f32 %v1464_v44, %v1464_v44 }
 0x15a   : > { %v939_v49 = vadd.f32 %v938_v45, %v566_v47  ;;  %v978_v50 = vmul.f32 %v566_v47, %v566_v47  ;;  %v1008_v51 = vadd.f32 %v1007_v43, %v977_v42  ;;  %v1465_v52 = vpop.f32.mrb[6].mxu0  ;;  %v2032_v53 = vpop.f32.mrb[6].mxu1 }
 0x15b   : > { %v1341_v54 = vpack.c.bf16 %v1465_v52, %v1464_v44  ;;  %v569_v55 = vpop.f32.mrb[7].mxu0  ;;  %v1381_v56 = vpack.c.bf16 %v2032_v53, %v2028_v46  ;;  %v2036_v57 = vpop.f32.mrb[7].mxu1  ;;  %v981_v2 = vmul.f32 %v1465_v52, %v1465_v52 }
 0x15c   : > { %v1009_v58 = vadd.f32 %v1008_v51, %v978_v50  ;;  %v1336_v59 = vpack.c.bf16 %v569_v55, %v566_v47  ;;  %v940_v60 = vadd.f32 %v939_v49, %v569_v55  ;;  %v979_v61 = vmul.f32 %v569_v55, %v569_v55 }
 0x15d   : > { %1405 = vst [vmem:[%s2022_s20 + $0x18] sm:$0xff] %v1341_v54   ;;  %1413 = vst [vmem:[%s2022_s20 + $0x58] sm:$0xff] %v1381_v56   ;;  %v1376_v62 = vpack.c.bf16 %v2036_v57, %v2030_v48 }
 0x15e   : > { %1404 = vst [vmem:[%s2022_s20 + $0x10] sm:$0xff] %v1336_v59   ;;  %v941_v0 = vadd.f32 %v1464_v44, %v940_v60  ;;  %v1010_v1 = vadd.f32 %v1009_v58, %v979_v61  ;;  %v990_v61 = vmul.f32 %v2010_v27, %v2010_v27 }
 0x15f   : > { %1412 = vst [vmem:[%s2022_s20 + $0x50] sm:$0xff] %v1376_v62  }
 0x160   : > { %v1011_v3 = vadd.f32 %v1010_v1, %v980_v63  ;;  %v1468_v4 = vpop.f32.mrb[8].mxu0  ;;  %v942_v5 = vadd.f32 %v1465_v52, %v941_v0  ;;  %v2044_v6 = vpop.f32.mrb[8].mxu1 }
 0x161   : > { %v582_v7 = vpop.f32.mrb[9].mxu0  ;;  %v2046_v8 = vpop.f32.mrb[9].mxu1  ;;  %v984_v23 = vmul.f32 %v1468_v4, %v1468_v4 }
 0x162   : > { %v943_v9 = vadd.f32 %v942_v5, %v582_v7  ;;  %v982_v10 = vmul.f32 %v582_v7, %v582_v7  ;;  %v1012_v11 = vadd.f32 %v1011_v3, %v981_v2  ;;  %v1469_v12 = vpop.f32.mrb[10].mxu0  ;;  %v2048_v13 = vpop.f32.mrb[10].mxu1 }
 0x163   : > { %v1351_v14 = vpack.c.bf16 %v1469_v12, %v1468_v4  ;;  %v585_v15 = vpop.f32.mrb[11].mxu0  ;;  %v1391_v16 = vpack.c.bf16 %v2048_v13, %v2044_v6  ;;  %v2052_v17 = vpop.f32.mrb[11].mxu1  ;;  %v985_v28 = vmul.f32 %v1469_v12, %v1469_v12 }
 0x164   : > { %v1013_v18 = vadd.f32 %v1012_v11, %v982_v10  ;;  %v1346_v19 = vpack.c.bf16 %v585_v15, %v582_v7  ;;  %v944_v20 = vadd.f32 %v943_v9, %v585_v15  ;;  %v983_v21 = vmul.f32 %v585_v15, %v585_v15 }
 0x165   : > { %1407 = vst [vmem:[%s2022_s20 + $0x28] sm:$0xff] %v1351_v14   ;;  %1415 = vst [vmem:[%s2022_s20 + $0x68] sm:$0xff] %v1391_v16   ;;  %v1386_v22 = vpack.c.bf16 %v2052_v17, %v2046_v8 }
 0x166   : > { %1406 = vst [vmem:[%s2022_s20 + $0x20] sm:$0xff] %v1346_v19   ;;  %v945_v24 = vadd.f32 %v1468_v4, %v944_v20  ;;  %v1014_v26 = vadd.f32 %v1013_v18, %v983_v21 }
 0x167   : > { %1414 = vst [vmem:[%s2022_s20 + $0x60] sm:$0xff] %v1386_v22  }
 0x168   : > { %v1015_v30 = vadd.f32 %v1014_v26, %v984_v23  ;;  %v1472_v31 = vpop.f32.mrb[12].mxu0  ;;  %v946_v32 = vadd.f32 %v1469_v12, %v945_v24  ;;  %v2060_v33 = vpop.f32.mrb[12].mxu1 }
 0x169   : > { %v598_v35 = vpop.f32.mrb[13].mxu0  ;;  %v2062_v36 = vpop.f32.mrb[13].mxu1  ;;  %v988_v54 = vmul.f32 %v1472_v31, %v1472_v31 }
 0x16a   : > { %v947_v37 = vadd.f32 %v946_v32, %v598_v35  ;;  %v986_v38 = vmul.f32 %v598_v35, %v598_v35  ;;  %v1016_v39 = vadd.f32 %v1015_v30, %v985_v28  ;;  %v1473_v40 = vpop.f32.mrb[14].mxu0  ;;  %v2066_v41 = vpop.f32.mrb[14].mxu1 }
 0x16b   : > { %v1361_v42 = vpack.c.bf16 %v1473_v40, %v1472_v31  ;;  %v601_v43 = vpop.f32.mrb[15].mxu0  ;;  %v1401_v44 = vpack.c.bf16 %v2066_v41, %v2060_v33  ;;  %v2070_v45 = vpop.f32.mrb[15].mxu1  ;;  %v989_v58 = vmul.f32 %v1473_v40, %v1473_v40 }
 0x16c   : > { %v1017_v47 = vadd.f32 %v1016_v39, %v986_v38  ;;  %v1356_v49 = vpack.c.bf16 %v601_v43, %v598_v35  ;;  %v948_v50 = vadd.f32 %v947_v37, %v601_v43  ;;  %v987_v51 = vmul.f32 %v601_v43, %v601_v43 }
 0x16d   : > { %1409 = vst [vmem:[%s2022_s20 + $0x38] sm:$0xff] %v1361_v42   ;;  %1417 = vst [vmem:[%s2022_s20 + $0x78] sm:$0xff] %v1401_v44   ;;  %v1396_v52 = vpack.c.bf16 %v2070_v45, %v2062_v36 }
 0x16e   : > { %1408 = vst [vmem:[%s2022_s20 + $0x30] sm:$0xff] %v1356_v49   ;;  %v949_v55 = vadd.f32 %v1472_v31, %v948_v50  ;;  %v1018_v56 = vadd.f32 %v1017_v47, %v987_v51 }
 0x16f   : > { %1416 = vst [vmem:[%s2022_s20 + $0x70] sm:$0xff] %v1396_v52  }
 0x170   : > { %v1019_v59 = vadd.f32 %v1018_v56, %v988_v54  ;;  %v950_v60 = vadd.f32 %v1473_v40, %v949_v55 }
 0x171   : > { %1683 = shalt.err (!%p1680_p5)
}
 0x172   : > { %s1684_s4 = scalar_lea.hbm %s2075_s9, 2048  ;;  %s1688_s7 = scalar_lea.hbm %s2213_s2, 4096 }
 0x173   : > { %p1685_p9 = scmp.ne.s32.totalorder %s2075_s9, %s1684_s4  ;;  %p1689_p3 = scmp.lt.u32.totalorder %s2075_s9, %s2213_s2 }
 0x174   : > { %p1690_p7 = scmp.lt.u32.totalorder %s1688_s7, %s1684_s4  ;;  %p1692_p4 = scmp.lt.u32.totalorder %s1684_s4, %s2075_s9 }
 0x175   : > { %p1686_p1 = pnand %p1685_p9, %p1917_p10 }
 0x176   : > { %p1691_p13 = por %p1690_p7, %p1689_p3 }
 0x177   : > { %p1687_p2 = pneg %p1686_p1 }
 0x178   : > { %p1693_p6 = por %p1692_p4, %p1691_p13 }
 0x17a   : > { %p1694_p8 = pnand %p1693_p6, %p1687_p2 }
 0x17c   : > { %1697 = shalt.err (!%p1694_p8)
}
 0x17d   : > { %s1795_s22 = smov 64   ;;  %s1796_s10 = smov 4   ;;  %v951_v62 = vadd.f32 %v950_v60, %v2010_v27  ;;  %v1020_v63 = vadd.f32 %v1019_v59, %v989_v58  ;;  %v991_v2 = vmul.f32 %v2016_v34, %v2016_v34  ;;  %v992_v3 = vmul.f32 %v2008_v25, %v2008_v25 }
 0x17e   : > { %1512 = dma.vmem_to_hbm [thread:$0]  (%p1917_p10), %s2077_s24, 2048, %s2075_s9, %s1045_s18, %s1795_s22, %s1795_s22, %s1796_s10   ;;  %v993_v7 = vmul.f32 %v2012_v29, %v2012_v29  ;;  %v994_v27 = vmul.f32 %v2030_v48, %v2030_v48  ;;  %v995_v15 = vmul.f32 %v2036_v57, %v2036_v57  ;;  %v999_v24 = vmul.f32 %v2052_v17, %v2052_v17 }
 0x17f   : > { %v1021_v0 = vadd.f32 %v1020_v63, %v990_v61  ;;  %v952_v1 = vadd.f32 %v951_v62, %v2016_v34  ;;  %v1004_v38 = vmul.f32 %v2060_v33, %v2060_v33  ;;  %v1005_v40 = vmul.f32 %v2066_v41, %v2066_v41  ;;  %s1225_s24 = sshll.u32 %s1976_s30, 1  ;;  %s1286_s11 = sshll.u32 %s1780_s15, 5 }
 0x180   : > { %s251_s9 = scalar_lea.vmem [#allocation9], %s1225_s24  ;;  %s2162_s26 = scalar_lea.hbm %s2214_s3, %s1286_s11 }
 0x181   : > { %v953_v4 = vadd.f32 %v2008_v25, %v952_v1  ;;  %v1022_v5 = vadd.f32 %v1021_v0, %v991_v2  ;;  %v996_v25 = vmul.f32 %v2028_v46, %v2028_v46  ;;  %s1081_s18 = sshll.u32 %s251_s9, 4  ;;  %s1050_s21 = scalar_lea.sflag [#allocation10], %s1976_s30  ;;  %s2164_s18 = int_to_ptr.vmem [resolvable:$true] %s1081_s18 }
 0x182   : > { %s1698_s4 = scalar_lea.vmem %s2164_s18, 32  ;;  %s1797_s15 = smov [#allocation9]  }
 0x183   : > { %v1023_v9 = vadd.f32 %v1022_v5, %v992_v3  ;;  %v954_v10 = vadd.f32 %v2012_v29, %v953_v4  ;;  %v997_v29 = vmul.f32 %v2032_v53, %v2032_v53  ;;  %p1699_p12 = scmp.ne.s32.totalorder %s2164_s18, %s1698_s4  ;;  %s1702_s6 = sshll.u32 %s1797_s15, 4  ;;  %s1703_s6 = int_to_ptr.vmem [resolvable:$false] %s1702_s6 }
 0x184   : > { %s1704_s29 = scalar_lea.vmem %s1703_s6, 64  ;;  %p1705_p5 = scmp.lt.s32.totalorder %s2164_s18, %s1703_s6 }
 0x185   : > { %v955_v11 = vadd.f32 %v954_v10, %v2030_v48  ;;  %v1024_v12 = vadd.f32 %v1023_v9, %v993_v7  ;;  %v998_v48 = vmul.f32 %v2046_v8, %v2046_v8  ;;  %p1700_p11 = pnand %p1699_p12, %p1917_p10  ;;  %p1706_p9 = scmp.lt.s32.totalorder %s1704_s29, %s1698_s4 }
 0x187   : > { %v1025_v14 = vadd.f32 %v1024_v12, %v994_v27  ;;  %v956_v34 = vadd.f32 %v955_v11, %v2036_v57  ;;  %p1701_p0 = pneg %p1700_p11  ;;  %p1707_p1 = por %p1706_p9, %p1705_p5 }
 0x189   : > { %v957_v16 = vadd.f32 %v2028_v46, %v956_v34  ;;  %v1026_v18 = vadd.f32 %v1025_v14, %v995_v15  ;;  %v1000_v46 = vmul.f32 %v2044_v6, %v2044_v6  ;;  %p1708_p2 = pnand %p1707_p1, %p1701_p0 }
 0x18b   : > { %v1027_v19 = vadd.f32 %v1026_v18, %v996_v25  ;;  %v958_v20 = vadd.f32 %v2032_v53, %v957_v16  ;;  %v1001_v53 = vmul.f32 %v2048_v13, %v2048_v13 }
 0x18d   : > { %v959_v21 = vadd.f32 %v958_v20, %v2046_v8  ;;  %v1028_v22 = vadd.f32 %v1027_v19, %v997_v29  ;;  %v1002_v8 = vmul.f32 %v2062_v36, %v2062_v36 }
 0x18f   : > { %v1029_v23 = vadd.f32 %v1028_v22, %v998_v48  ;;  %v960_v57 = vadd.f32 %v959_v21, %v2052_v17 }
 0x191   : > { %v961_v26 = vadd.f32 %v2044_v6, %v960_v57  ;;  %v1030_v28 = vadd.f32 %v1029_v23, %v999_v24  ;;  %v1003_v6 = vmul.f32 %v2070_v45, %v2070_v45 }
 0x193   : > { %v1031_v30 = vadd.f32 %v1030_v28, %v1000_v46  ;;  %v962_v31 = vadd.f32 %v2048_v13, %v961_v26 }
 0x195   : > { %v963_v32 = vadd.f32 %v962_v31, %v2062_v36  ;;  %v1032_v35 = vadd.f32 %v1031_v30, %v1001_v53 }
 0x197   : > { %v1033_v17 = vadd.f32 %v1032_v35, %v1002_v8  ;;  %v964_v37 = vadd.f32 %v963_v32, %v2070_v45 }
 0x199   : > { %v965_v39 = vadd.f32 %v2060_v33, %v964_v37  ;;  %v1034_v13 = vadd.f32 %v1033_v17, %v1003_v6 }
 0x19b   : > { %v966_v42 = vadd.f32 %v2066_v41, %v965_v39  ;;  %v1035_v36 = vadd.f32 %v1034_v13, %v1004_v38 }
 0x19d   : > { %v967_v43 = vrot.slane %v966_v42, 4  ;;  %v1036_v44 = vadd.f32 %v1035_v36, %v1005_v40 }
 0x19f   : > { %v968_v47 = vadd.f32 %v967_v43, %v966_v42  ;;  %v1037_v49 = vrot.slane %v1036_v44, 4 }
 0x1a1   : > { %v969_v50 = vrot.slane %v968_v47, 2  ;;  %v1038_v45 = vadd.f32 %v1037_v49, %v1036_v44 }
 0x1a3   : > { %v970_v51 = vadd.f32 %v969_v50, %v968_v47  ;;  %v1039_v52 = vrot.slane %v1038_v45, 2 }
 0x1a5   : > { %v971_v33 = vrot.slane %v970_v51, 1  ;;  %v1040_v54 = vadd.f32 %v1039_v52, %v1038_v45 }
 0x1a7   : > { %v972_v55 = vadd.f32 %v971_v33, %v970_v51  ;;  %v1041_v56 = vrot.slane %v1040_v54, 1 }
 0x1a9   : > { %973 = vst [vmem:[%s251_s9] sm:$0x1] %v972_v55  ;;  %v1042_v41 = vadd.f32 %v1041_v56, %v1040_v54 }
 0x1ab   : > { %1043 = vst [vmem:[%s251_s9 + $0x1] sm:$0x1] %v1042_v41 }
 0x1ac   : > { %1711 = shalt.err (!%p1708_p2)
}
 0x1ad   : > { %s1712_s30 = scalar_lea.hbm %s2162_s26, 32  ;;  %s1716_s20 = scalar_lea.hbm %s2214_s3, 64 }
 0x1ae   : > { %p1713_p3 = scmp.ne.s32.totalorder %s2162_s26, %s1712_s30  ;;  %p1717_p4 = scmp.lt.u32.totalorder %s2162_s26, %s2214_s3 }
 0x1af   : > { %p1718_p6 = scmp.lt.u32.totalorder %s1716_s20, %s1712_s30  ;;  %p1720_p12 = scmp.lt.u32.totalorder %s1712_s30, %s2162_s26 }
 0x1b0   : > { %p1714_p7 = pnand %p1713_p3, %p1917_p10 }
 0x1b1   : > { %p1719_p8 = por %p1718_p6, %p1717_p4 }
 0x1b2   : > { %p1715_p13 = pneg %p1714_p7 }
 0x1b3   : > { %p1721_p11 = por %p1720_p12, %p1719_p8 }
 0x1b5   : > { %p1722_p0 = pnand %p1721_p11, %p1715_p13 }
 0x1b7   : > { %1725 = shalt.err (!%p1722_p0)
}
 0x1b8   : > { %1513 = dma.vmem_to_hbm [thread:$0]  (%p1917_p10), %s2164_s18, 32, %s2162_s26, %s1050_s21  }
 0x1b9 PF: > { %s1093_s24 = sand.u32 1, %s1768_s12   ;;  %p2232_p5 = scmp.ne.s32.totalorder %s2222_s23, 0 }
 0x1ba   : > { %p2233_p9 = scmp.ge.s32.totalorder %s1788_s17, 2  ;;  %s1094_s11 = scalar_lea.sflag [#allocation5], %s1093_s24 }
 0x1bc   : > { %p1525_p1 = pnand %p2233_p9, %p2232_p5 }
 0x1be   : > { %1759 = dma.done.wait (!%p1525_p1), %s1094_s11, 2048  }
 0x1bf   : > { %1761 = vsyncadd (!%p1525_p1), %s1094_s11, 4294965248  ;;  %s1103_s9 = scalar_lea.sflag [#allocation10], %s1093_s24 }
 0x1c0   : > { %1763 = dma.done.wait (!%p1525_p1), %s1103_s9, 32  }
 0x1c1   : > { %1765 = vsyncadd (!%p1525_p1), %s1103_s9, 4294967264  ;;  %s24_s17 = sadd.s32 1, %s1788_s17   ;;  %s2234_s12 = smov %s1772_s13 }
 0x1c2   : > { %p21_p2 = scmp.ge.s32.totalorder %s24_s17, 4   ;;  %s2235_s13 = smov %s1776_s14 }
 0x1c3   : > { %s2236_s14 = smov %s1926_s5  ;;  %s2237_s15 = smov %s1784_s16 }
 0x1c4   : > { %s2238_s16 = smov %s2240_s28  ;;  %23 = sbr.rel (!%p21_p2) target bundleno = 9 (0x9), region = 103 }
 0x1cb   :  { %1108 = vsyncpa [#allocation4], 1 }
 0x1cc   :  { %1110 = vsyncpa [#allocation4 + $0x1], 1 }
 0x1cd   :  { %1111 = vsyncpa [#allocation7], 1 }
 0x1ce   :  { %1112 = vsyncpa [#allocation5], 1 }
 0x1cf   :  { %1114 = vsyncpa [#allocation5 + $0x1], 1 }
 0x1d0   :  { %1115 = vsyncpa [#allocation10], 1 }
 0x1d1   :  { %1117 = vsyncpa [#allocation10 + $0x1], 1 }

</bundles_post_ra>
